<compile_context>
chip_gen: v7x
topology: tpu7x:2x2x1
jax: 0.10.0
libtpu: 0.0.40
codegen_flags: <defaults>
</compile_context>

<pallas_src>
import functools

import jax
import jax.numpy as jnp
from jax.experimental import pallas as pl
from jax.experimental.pallas import tpu as pltpu


# ----------------------------------------------------------------------------
# helpers
# ----------------------------------------------------------------------------
def _round_up(x: int, m: int) -> int:
    return ((x + m - 1) // m) * m


def _gen_mlp(x, w1, b1, w2, b2, w3, b3, w4, b4, w5, b5):
    """Generator 5-layer MLP (Tanh x4, linear output) on loaded VMEM arrays."""
    h = jnp.tanh(jnp.dot(x, w1, preferred_element_type=jnp.float32) + b1)
    h = jnp.tanh(jnp.dot(h, w2, preferred_element_type=jnp.float32) + b2)
    h = jnp.tanh(jnp.dot(h, w3, preferred_element_type=jnp.float32) + b3)
    h = jnp.tanh(jnp.dot(h, w4, preferred_element_type=jnp.float32) + b4)
    return jnp.dot(h, w5, preferred_element_type=jnp.float32) + b5


# ----------------------------------------------------------------------------
# Pallas kernels
# ----------------------------------------------------------------------------
def _fused_kernel(num_true, out_num, action_channels,
                  states_ref, true_ref,
                  gw1, gb1, gw2, gb2, gw3, gb3, gw4, gb4, gw5, gb5,
                  dw1s, dw1a, db1, dw2, db2, dw3, db3, dw4r, db4,
                  disc_ref, gen_ref):
    """Fused generator + discriminator for one row-tile of the batch.

    states_ref: [TN, S]          true_ref: [TN, T*A]
    disc_ref:   [TN, T+O]        gen_ref:  [TN, O*A]
    """
    x = states_ref[...]                      # [TN, S]
    tn = x.shape[0]
    a = action_channels
    k_total = num_true + out_num

    # --- generator ---
    gen = _gen_mlp(x, gw1[...], gb1[...], gw2[...], gb2[...], gw3[...], gb3[...],
                   gw4[...], gb4[...], gw5[...], gb5[...])           # [TN, O*A]
    gen_ref[...] = gen

    # --- discriminator layer 1, split: conditioned @ W1 == states@W1s + action@W1a ---
    # state projection (bias folded in) computed once, reused across all T+O slots.
    s_proj = jnp.dot(x, dw1s[...], preferred_element_type=jnp.float32) + db1[...]  # [TN, 2A]

    true_flat = true_ref[...]                                        # [TN, T*A]
    act_list = [true_flat[:, k * a:(k + 1) * a] for k in range(num_true)]
    act_list += [gen[:, k * a:(k + 1) * a] for k in range(out_num)]
    act_all = jnp.concatenate(act_list, axis=0)                      # [K*TN, A]
    s_rep = jnp.concatenate([s_proj] * k_total, axis=0)              # [K*TN, 2A]

    h = jnp.tanh(s_rep + jnp.dot(act_all, dw1a[...],
                                 preferred_element_type=jnp.float32))
    h = jnp.tanh(jnp.dot(h, dw2[...], preferred_element_type=jnp.float32) + db2[...])
    h = jnp.tanh(jnp.dot(h, dw3[...], preferred_element_type=jnp.float32) + db3[...])
    # final 1-wide layer: VPU multiply + lane reduce (no MXU pass, no 1-lane store)
    logits = jnp.sum(h * dw4r[...], axis=-1, keepdims=True) + db4[...]   # [K*TN, 1]
    cols = [logits[k * tn:(k + 1) * tn, :] for k in range(k_total)]
    disc_ref[...] = jax.nn.sigmoid(jnp.concatenate(cols, axis=1))        # [TN, K]


def _generator_only_kernel(x_ref,
                           gw1, gb1, gw2, gb2, gw3, gb3, gw4, gb4, gw5, gb5,
                           out_ref):
    out_ref[...] = _gen_mlp(x_ref[...], gw1[...], gb1[...], gw2[...], gb2[...],
                            gw3[...], gb3[...], gw4[...], gb4[...], gw5[...], gb5[...])


# ----------------------------------------------------------------------------
# Parameter init (deterministic, PyTorch-Linear-style uniform init)
# ----------------------------------------------------------------------------
def _init_linear(key, fan_in, fan_out):
    kw, kb = jax.random.split(key)
    bound = 1.0 / jnp.sqrt(jnp.float32(fan_in))
    w = jax.random.uniform(kw, (fan_in, fan_out), jnp.float32, -bound, bound)
    b = jax.random.uniform(kb, (fan_out,), jnp.float32, -bound, bound)
    return (w, b)


class ActionGeneratorPallas:
    def __init__(self, state_channels: int, action_channels: int, out_num: int,
                 key=jax.random.PRNGKey(0)):
        self.state_channels = state_channels
        self.action_channels = action_channels
        self.out_num = out_num
        base = state_channels + action_channels
        self.base_channels = base

        gen_dims = [(state_channels, base * 2),
                    (base * 2, base * 2),
                    (base * 2, base * 2),
                    (base * 2, base),
                    (base, action_channels * out_num)]
        disc_dims = [(base, action_channels * 2),
                     (action_channels * 2, action_channels * 2),
                     (action_channels * 2, action_channels),
                     (action_channels, 1)]

        keys = jax.random.split(key, len(gen_dims) + len(disc_dims))
        self.gen_params = [_init_linear(keys[i], fi, fo)
                           for i, (fi, fo) in enumerate(gen_dims)]
        self.disc_params = [_init_linear(keys[len(gen_dims) + i], fi, fo)
                            for i, (fi, fo) in enumerate(disc_dims)]

        # flattened generator params (biases kept 2D for TPU layout)
        self._gen_flat = []
        for w, b in self.gen_params:
            self._gen_flat += [w, b.reshape(1, -1)]

        # discriminator params, with W1 split into state/action halves and the
        # final 1-wide layer stored as a row vector for a VPU reduction.
        (dw1, db1), (dw2, db2), (dw3, db3), (dw4, db4) = self.disc_params
        self._disc_flat = [
            dw1[:state_channels, :],        # W1_state  [S, 2A]
            dw1[state_channels:, :],        # W1_action [A, 2A]
            db1.reshape(1, -1),
            dw2, db2.reshape(1, -1),
            dw3, db3.reshape(1, -1),
            dw4.reshape(1, -1),             # [1, A]
            db4.reshape(1, 1),
        ]

    # --- fused forward ---
    def forward(self, states, true_samples, tile_n=None):
        n, s = states.shape
        t = true_samples.shape[1]
        a = self.action_channels
        o = self.out_num
        k_total = t + o
        base = self.base_channels

        true_flat = true_samples.reshape(n, t * a)

        # row tiling: multiple of 8 sublanes, default cap 128 rows per tile
        if tile_n is None:
            tile_n = min(128, _round_up(n, 8))
        tile_n = max(8, _round_up(tile_n, 8))
        n_pad = _round_up(n, tile_n)
        if n_pad != n:
            pad = n_pad - n
            states_p = jnp.pad(states, ((0, pad), (0, 0)))
            true_p = jnp.pad(true_flat, ((0, pad), (0, 0)))
        else:
            states_p, true_p = states, true_flat

        grid = (n_pad // tile_n,)

        params = self._gen_flat + self._disc_flat

        def const_spec(p):
            # weights/biases: full-array block, constant index -> loaded once, VMEM-resident
            return pl.BlockSpec(p.shape, lambda i: (0, 0))

        in_specs = [pl.BlockSpec((tile_n, s), lambda i: (i, 0)),
                    pl.BlockSpec((tile_n, t * a), lambda i: (i, 0))]
        in_specs += [const_spec(p) for p in params]

        out_specs = (pl.BlockSpec((tile_n, k_total), lambda i: (i, 0)),
                     pl.BlockSpec((tile_n, o * a), lambda i: (i, 0)))
        out_shape = (jax.ShapeDtypeStruct((n_pad, k_total), jnp.float32),
                     jax.ShapeDtypeStruct((n_pad, o * a), jnp.float32))

        # advisory cost estimate (rough)
        flops = 2 * n_pad * (s * 2 * base + 2 * (2 * base) ** 2
                             + 2 * base * base + base * a * o)
        flops += 2 * n_pad * s * 2 * a
        flops += 2 * n_pad * k_total * (a * 2 * a + (2 * a) ** 2 + 2 * a * a + a)
        transc = n_pad * (3 * 2 * base + base) + n_pad * k_total * (5 * a + 1)
        bytes_acc = 4 * (n_pad * (s + t * a + k_total + o * a)
                         + sum(int(p.size) for p in params))
        cost = pl.CostEstimate(flops=int(flops), transcendentals=int(transc),
                               bytes_accessed=int(bytes_acc))

        kernel = functools.partial(_fused_kernel, t, o, a)

        disc_out, gen_flat = pl.pallas_call(
            kernel,
            grid=grid,
            in_specs=in_specs,
            out_specs=out_specs,
            out_shape=out_shape,
            compiler_params=pltpu.CompilerParams(
                dimension_semantics=("parallel",),
                vmem_limit_bytes=32 * 1024 * 1024),
            cost_estimate=cost,
        )(states_p, true_p, *params)

        disc_out = disc_out[:n]
        generated = gen_flat[:n].reshape(n, o, a)
        return disc_out, generated

    __call__ = forward

    # --- generator-only path ---
    def generate(self, state):
        x = state.reshape(1, -1)
        n_in = 1 + len(self._gen_flat)
        out = pl.pallas_call(
            _generator_only_kernel,
            out_shape=jax.ShapeDtypeStruct(
                (1, self.action_channels * self.out_num), jnp.float32),
            in_specs=[pl.BlockSpec(memory_space=pltpu.MemorySpace.VMEM)] * n_in,
            out_specs=pl.BlockSpec(memory_space=pltpu.MemorySpace.VMEM),
        )(x, *self._gen_flat)
        return out.reshape(self.out_num, self.action_channels)


# ----------------------------------------------------------------------------
# Pure-JAX reference for correctness check
# ----------------------------------------------------------------------------
def _ref_mlp(x, params, last_act):
    h = x
    for i, (w, b) in enumerate(params):
        h = h @ w + b
        h = jnp.tanh(h) if i < len(params) - 1 else last_act(h)
    return h


def _ref_forward(model, states, true_samples):
    n = states.shape[0]
    gen = _ref_mlp(states, model.gen_params, lambda z: z)
    gen = gen.reshape(n, model.out_num, model.action_channels)
    actions = jnp.concatenate([true_samples, gen], axis=1)
    k = actions.shape[1]
    exp_states = jnp.broadcast_to(states[:, None, :],
                                  (n, k, model.state_channels))
    cond = jnp.concatenate([exp_states, actions], axis=2)
    disc = _ref_mlp(cond.reshape(n * k, model.base_channels),
                    model.disc_params, jax.nn.sigmoid).reshape(n, k)
    return disc, gen


# ----------------------------------------------------------------------------
if __name__ == "__main__":
    state_channels = 16
    action_channels = 8
    out_num = 4
    batch = 4
    num_true = 3

    key = jax.random.PRNGKey(0)
    k_params, k_states, k_true, k_s2, k_t2 = jax.random.split(key, 5)

    model = ActionGeneratorPallas(state_channels, action_channels, out_num,
                                  key=k_params)

    states = jax.random.normal(k_states, (batch, state_channels), jnp.float32)
    true_samples = jax.random.normal(k_true, (batch, num_true, action_channels),
                                     jnp.float32)

    disc_out, generated = model(states, true_samples)
    disc_out = jax.block_until_ready(disc_out)
    generated = jax.block_until_ready(generated)

    disc_ref, gen_ref = _ref_forward(model, states, true_samples)
    assert disc_out.shape == (batch, num_true + out_num)
    assert generated.shape == (batch, out_num, action_channels)
    assert jnp.allclose(disc_out, disc_ref, atol=1e-4, rtol=1e-4)
    assert jnp.allclose(generated, gen_ref, atol=1e-4, rtol=1e-4)

    # exercise the gridded / padded path (grid > 1, row padding sliced off)
    batch2 = 20
    states2 = jax.random.normal(k_s2, (batch2, state_channels), jnp.float32)
    true2 = jax.random.normal(k_t2, (batch2, num_true, action_channels),
                              jnp.float32)
    disc2, gen2 = model.forward(states2, true2, tile_n=8)
    disc2 = jax.block_until_ready(disc2)
    gen2 = jax.block_until_ready(gen2)
    disc2_ref, gen2_ref = _ref_forward(model, states2, true2)
    assert jnp.allclose(disc2, disc2_ref, atol=1e-4, rtol=1e-4)
    assert jnp.allclose(gen2, gen2_ref, atol=1e-4, rtol=1e-4)

    # also exercise .generate()
    single = jax.block_until_ready(model.generate(states[0]))
    assert single.shape == (out_num, action_channels)
    assert jnp.allclose(single,
                        _ref_mlp(states[0:1], model.gen_params, lambda z: z)
                        .reshape(out_num, action_channels),
                        atol=1e-4, rtol=1e-4)

    print("KERNEL_OK")
</pallas_src>

<mosaic_0001>
module attributes {stable_mosaic.version = 11 : i64} {
  func.func @_fused_kernel(%arg0: i32, %arg1: memref<8x16xf32, #tpu.memory_space<vmem>>, %arg2: memref<8x24xf32, #tpu.memory_space<vmem>>, %arg3: memref<16x48xf32, #tpu.memory_space<vmem>>, %arg4: memref<1x48xf32, #tpu.memory_space<vmem>>, %arg5: memref<48x48xf32, #tpu.memory_space<vmem>>, %arg6: memref<1x48xf32, #tpu.memory_space<vmem>>, %arg7: memref<48x48xf32, #tpu.memory_space<vmem>>, %arg8: memref<1x48xf32, #tpu.memory_space<vmem>>, %arg9: memref<48x24xf32, #tpu.memory_space<vmem>>, %arg10: memref<1x24xf32, #tpu.memory_space<vmem>>, %arg11: memref<24x32xf32, #tpu.memory_space<vmem>>, %arg12: memref<1x32xf32, #tpu.memory_space<vmem>>, %arg13: memref<16x16xf32, #tpu.memory_space<vmem>>, %arg14: memref<8x16xf32, #tpu.memory_space<vmem>>, %arg15: memref<1x16xf32, #tpu.memory_space<vmem>>, %arg16: memref<16x16xf32, #tpu.memory_space<vmem>>, %arg17: memref<1x16xf32, #tpu.memory_space<vmem>>, %arg18: memref<16x8xf32, #tpu.memory_space<vmem>>, %arg19: memref<1x8xf32, #tpu.memory_space<vmem>>, %arg20: memref<1x8xf32, #tpu.memory_space<vmem>>, %arg21: memref<1x1xf32, #tpu.memory_space<vmem>>, %arg22: memref<8x7xf32, #tpu.memory_space<vmem>>, %arg23: memref<8x32xf32, #tpu.memory_space<vmem>>) attributes {dimension_semantics = [#tpu.dimension_semantics<parallel>], iteration_bounds = array<i64: 1>, scalar_prefetch = 0 : i64, scratch_operands = 0 : i64, tpu.core_type = #tpu.core_type<tc>, window_params = [{transform_indices = @transform_0, window_bounds = array<i64: 8, 16>}, {transform_indices = @transform_1, window_bounds = array<i64: 8, 24>}, {pipeline_mode = #tpu.pipeline_mode<synchronous>, transform_indices = @transform_2, window_bounds = array<i64: 16, 48>}, {pipeline_mode = #tpu.pipeline_mode<synchronous>, transform_indices = @transform_3, window_bounds = array<i64: 1, 48>}, {pipeline_mode = #tpu.pipeline_mode<synchronous>, transform_indices = @transform_4, window_bounds = array<i64: 48, 48>}, {pipeline_mode = #tpu.pipeline_mode<synchronous>, transform_indices = @transform_5, window_bounds = array<i64: 1, 48>}, {pipeline_mode = #tpu.pipeline_mode<synchronous>, transform_indices = @transform_6, window_bounds = array<i64: 48, 48>}, {pipeline_mode = #tpu.pipeline_mode<synchronous>, transform_indices = @transform_7, window_bounds = array<i64: 1, 48>}, {pipeline_mode = #tpu.pipeline_mode<synchronous>, transform_indices = @transform_8, window_bounds = array<i64: 48, 24>}, {pipeline_mode = #tpu.pipeline_mode<synchronous>, transform_indices = @transform_9, window_bounds = array<i64: 1, 24>}, {pipeline_mode = #tpu.pipeline_mode<synchronous>, transform_indices = @transform_10, window_bounds = array<i64: 24, 32>}, {pipeline_mode = #tpu.pipeline_mode<synchronous>, transform_indices = @transform_11, window_bounds = array<i64: 1, 32>}, {pipeline_mode = #tpu.pipeline_mode<synchronous>, transform_indices = @transform_12, window_bounds = array<i64: 16, 16>}, {pipeline_mode = #tpu.pipeline_mode<synchronous>, transform_indices = @transform_13, window_bounds = array<i64: 8, 16>}, {pipeline_mode = #tpu.pipeline_mode<synchronous>, transform_indices = @transform_14, window_bounds = array<i64: 1, 16>}, {pipeline_mode = #tpu.pipeline_mode<synchronous>, transform_indices = @transform_15, window_bounds = array<i64: 16, 16>}, {pipeline_mode = #tpu.pipeline_mode<synchronous>, transform_indices = @transform_16, window_bounds = array<i64: 1, 16>}, {pipeline_mode = #tpu.pipeline_mode<synchronous>, transform_indices = @transform_17, window_bounds = array<i64: 16, 8>}, {pipeline_mode = #tpu.pipeline_mode<synchronous>, transform_indices = @transform_18, window_bounds = array<i64: 1, 8>}, {pipeline_mode = #tpu.pipeline_mode<synchronous>, transform_indices = @transform_19, window_bounds = array<i64: 1, 8>}, {pipeline_mode = #tpu.pipeline_mode<synchronous>, transform_indices = @transform_20, window_bounds = array<i64: 1, 1>}, {transform_indices = @transform_21, window_bounds = array<i64: 8, 7>}, {transform_indices = @transform_22, window_bounds = array<i64: 8, 32>}]} {
    %c0 = arith.constant 0 : index
    %c0_0 = arith.constant 0 : index
    %0 = vector.load %arg1[%c0, %c0_0] : memref<8x16xf32, #tpu.memory_space<vmem>>, vector<8x16xf32>
    %c0_1 = arith.constant 0 : index
    %c0_2 = arith.constant 0 : index
    %1 = vector.load %arg3[%c0_1, %c0_2] : memref<16x48xf32, #tpu.memory_space<vmem>>, vector<16x48xf32>
    %c0_3 = arith.constant 0 : index
    %c0_4 = arith.constant 0 : index
    %2 = vector.load %arg4[%c0_3, %c0_4] : memref<1x48xf32, #tpu.memory_space<vmem>>, vector<1x48xf32>
    %c0_5 = arith.constant 0 : index
    %c0_6 = arith.constant 0 : index
    %3 = vector.load %arg5[%c0_5, %c0_6] : memref<48x48xf32, #tpu.memory_space<vmem>>, vector<48x48xf32>
    %c0_7 = arith.constant 0 : index
    %c0_8 = arith.constant 0 : index
    %4 = vector.load %arg6[%c0_7, %c0_8] : memref<1x48xf32, #tpu.memory_space<vmem>>, vector<1x48xf32>
    %c0_9 = arith.constant 0 : index
    %c0_10 = arith.constant 0 : index
    %5 = vector.load %arg7[%c0_9, %c0_10] : memref<48x48xf32, #tpu.memory_space<vmem>>, vector<48x48xf32>
    %c0_11 = arith.constant 0 : index
    %c0_12 = arith.constant 0 : index
    %6 = vector.load %arg8[%c0_11, %c0_12] : memref<1x48xf32, #tpu.memory_space<vmem>>, vector<1x48xf32>
    %c0_13 = arith.constant 0 : index
    %c0_14 = arith.constant 0 : index
    %7 = vector.load %arg9[%c0_13, %c0_14] : memref<48x24xf32, #tpu.memory_space<vmem>>, vector<48x24xf32>
    %c0_15 = arith.constant 0 : index
    %c0_16 = arith.constant 0 : index
    %8 = vector.load %arg10[%c0_15, %c0_16] : memref<1x24xf32, #tpu.memory_space<vmem>>, vector<1x24xf32>
    %c0_17 = arith.constant 0 : index
    %c0_18 = arith.constant 0 : index
    %9 = vector.load %arg11[%c0_17, %c0_18] : memref<24x32xf32, #tpu.memory_space<vmem>>, vector<24x32xf32>
    %c0_19 = arith.constant 0 : index
    %c0_20 = arith.constant 0 : index
    %10 = vector.load %arg12[%c0_19, %c0_20] : memref<1x32xf32, #tpu.memory_space<vmem>>, vector<1x32xf32>
    %cst = arith.constant dense<0.000000e+00> : vector<8x48xf32>
    %11 = tpu.matmul %0, %1, %cst {dimension_numbers = #tpu.dot_dimension_numbers<[1], [0], [0], [1], [0, 0, 1, 1], [], []>} : vector<8x16xf32>, vector<16x48xf32>, vector<8x48xf32> -> vector<8x48xf32>
    %12 = vector.broadcast %2 : vector<1x48xf32> to vector<8x48xf32>
    %13 = arith.addf %11, %12 : vector<8x48xf32>
    %14 = math.tanh %13 : vector<8x48xf32>
    %cst_21 = arith.constant dense<0.000000e+00> : vector<8x48xf32>
    %15 = tpu.matmul %14, %3, %cst_21 {dimension_numbers = #tpu.dot_dimension_numbers<[1], [0], [0], [1], [0, 0, 1, 1], [], []>} : vector<8x48xf32>, vector<48x48xf32>, vector<8x48xf32> -> vector<8x48xf32>
    %16 = vector.broadcast %4 : vector<1x48xf32> to vector<8x48xf32>
    %17 = arith.addf %15, %16 : vector<8x48xf32>
    %18 = math.tanh %17 : vector<8x48xf32>
    %cst_22 = arith.constant dense<0.000000e+00> : vector<8x48xf32>
    %19 = tpu.matmul %18, %5, %cst_22 {dimension_numbers = #tpu.dot_dimension_numbers<[1], [0], [0], [1], [0, 0, 1, 1], [], []>} : vector<8x48xf32>, vector<48x48xf32>, vector<8x48xf32> -> vector<8x48xf32>
    %20 = vector.broadcast %6 : vector<1x48xf32> to vector<8x48xf32>
    %21 = arith.addf %19, %20 : vector<8x48xf32>
    %22 = math.tanh %21 : vector<8x48xf32>
    %cst_23 = arith.constant dense<0.000000e+00> : vector<8x24xf32>
    %23 = tpu.matmul %22, %7, %cst_23 {dimension_numbers = #tpu.dot_dimension_numbers<[1], [0], [0], [1], [0, 0, 1, 1], [], []>} : vector<8x48xf32>, vector<48x24xf32>, vector<8x24xf32> -> vector<8x24xf32>
    %24 = vector.broadcast %8 : vector<1x24xf32> to vector<8x24xf32>
    %25 = arith.addf %23, %24 : vector<8x24xf32>
    %26 = math.tanh %25 : vector<8x24xf32>
    %cst_24 = arith.constant dense<0.000000e+00> : vector<8x32xf32>
    %27 = tpu.matmul %26, %9, %cst_24 {dimension_numbers = #tpu.dot_dimension_numbers<[1], [0], [0], [1], [0, 0, 1, 1], [], []>} : vector<8x24xf32>, vector<24x32xf32>, vector<8x32xf32> -> vector<8x32xf32>
    %28 = vector.broadcast %10 : vector<1x32xf32> to vector<8x32xf32>
    %29 = arith.addf %27, %28 : vector<8x32xf32>
    %c0_25 = arith.constant 0 : index
    %c0_26 = arith.constant 0 : index
    %30 = vector.load %arg23[%c0_25, %c0_26] : memref<8x32xf32, #tpu.memory_space<vmem>>, vector<8x32xf32>
    tpu.vector_store %arg23[%c0_25, %c0_26], %29 {strides = array<i32>} : memref<8x32xf32, #tpu.memory_space<vmem>>, vector<8x32xf32>,
    %c0_27 = arith.constant 0 : index
    %c0_28 = arith.constant 0 : index
    %31 = vector.load %arg13[%c0_27, %c0_28] : memref<16x16xf32, #tpu.memory_space<vmem>>, vector<16x16xf32>
    %cst_29 = arith.constant dense<0.000000e+00> : vector<8x16xf32>
    %32 = tpu.matmul %0, %31, %cst_29 {dimension_numbers = #tpu.dot_dimension_numbers<[1], [0], [0], [1], [0, 0, 1, 1], [], []>} : vector<8x16xf32>, vector<16x16xf32>, vector<8x16xf32> -> vector<8x16xf32>
    %c0_30 = arith.constant 0 : index
    %c0_31 = arith.constant 0 : index
    %33 = vector.load %arg15[%c0_30, %c0_31] : memref<1x16xf32, #tpu.memory_space<vmem>>, vector<1x16xf32>
    %34 = vector.broadcast %33 : vector<1x16xf32> to vector<8x16xf32>
    %35 = arith.addf %32, %34 : vector<8x16xf32>
    %c0_32 = arith.constant 0 : index
    %c0_33 = arith.constant 0 : index
    %36 = vector.load %arg2[%c0_32, %c0_33] : memref<8x24xf32, #tpu.memory_space<vmem>>, vector<8x24xf32>
    %37 = vector.extract_strided_slice %36 {offsets = [0, 0], sizes = [8, 8], strides = [1, 1]} : vector<8x24xf32> to vector<8x8xf32>
    %38 = vector.extract_strided_slice %36 {offsets = [0, 8], sizes = [8, 8], strides = [1, 1]} : vector<8x24xf32> to vector<8x8xf32>
    %39 = vector.extract_strided_slice %36 {offsets = [0, 16], sizes = [8, 8], strides = [1, 1]} : vector<8x24xf32> to vector<8x8xf32>
    %40 = vector.extract_strided_slice %29 {offsets = [0, 0], sizes = [8, 8], strides = [1, 1]} : vector<8x32xf32> to vector<8x8xf32>
    %41 = vector.extract_strided_slice %29 {offsets = [0, 8], sizes = [8, 8], strides = [1, 1]} : vector<8x32xf32> to vector<8x8xf32>
    %42 = vector.extract_strided_slice %29 {offsets = [0, 16], sizes = [8, 8], strides = [1, 1]} : vector<8x32xf32> to vector<8x8xf32>
    %43 = vector.extract_strided_slice %29 {offsets = [0, 24], sizes = [8, 8], strides = [1, 1]} : vector<8x32xf32> to vector<8x8xf32>
    %44 = tpu.concatenate %37, %38, %39, %40, %41, %42, %43 in 0 : vector<8x8xf32>, vector<8x8xf32>, vector<8x8xf32>, vector<8x8xf32>, vector<8x8xf32>, vector<8x8xf32>, vector<8x8xf32> -> vector<56x8xf32>
    %45 = tpu.concatenate %35, %35, %35, %35, %35, %35, %35 in 0 : vector<8x16xf32>, vector<8x16xf32>, vector<8x16xf32>, vector<8x16xf32>, vector<8x16xf32>, vector<8x16xf32>, vector<8x16xf32> -> vector<56x16xf32>
    %c0_34 = arith.constant 0 : index
    %c0_35 = arith.constant 0 : index
    %46 = vector.load %arg14[%c0_34, %c0_35] : memref<8x16xf32, #tpu.memory_space<vmem>>, vector<8x16xf32>
    %cst_36 = arith.constant dense<0.000000e+00> : vector<56x16xf32>
    %47 = tpu.matmul %44, %46, %cst_36 {dimension_numbers = #tpu.dot_dimension_numbers<[1], [0], [0], [1], [0, 0, 1, 1], [], []>} : vector<56x8xf32>, vector<8x16xf32>, vector<56x16xf32> -> vector<56x16xf32>
    %48 = arith.addf %45, %47 : vector<56x16xf32>
    %49 = math.tanh %48 : vector<56x16xf32>
    %c0_37 = arith.constant 0 : index
    %c0_38 = arith.constant 0 : index
    %50 = vector.load %arg16[%c0_37, %c0_38] : memref<16x16xf32, #tpu.memory_space<vmem>>, vector<16x16xf32>
    %cst_39 = arith.constant dense<0.000000e+00> : vector<56x16xf32>
    %51 = tpu.matmul %49, %50, %cst_39 {dimension_numbers = #tpu.dot_dimension_numbers<[1], [0], [0], [1], [0, 0, 1, 1], [], []>} : vector<56x16xf32>, vector<16x16xf32>, vector<56x16xf32> -> vector<56x16xf32>
    %c0_40 = arith.constant 0 : index
    %c0_41 = arith.constant 0 : index
    %52 = vector.load %arg17[%c0_40, %c0_41] : memref<1x16xf32, #tpu.memory_space<vmem>>, vector<1x16xf32>
    %53 = vector.broadcast %52 : vector<1x16xf32> to vector<56x16xf32>
    %54 = arith.addf %51, %53 : vector<56x16xf32>
    %55 = math.tanh %54 : vector<56x16xf32>
    %c0_42 = arith.constant 0 : index
    %c0_43 = arith.constant 0 : index
    %56 = vector.load %arg18[%c0_42, %c0_43] : memref<16x8xf32, #tpu.memory_space<vmem>>, vector<16x8xf32>
    %cst_44 = arith.constant dense<0.000000e+00> : vector<56x8xf32>
    %57 = tpu.matmul %55, %56, %cst_44 {dimension_numbers = #tpu.dot_dimension_numbers<[1], [0], [0], [1], [0, 0, 1, 1], [], []>} : vector<56x16xf32>, vector<16x8xf32>, vector<56x8xf32> -> vector<56x8xf32>
    %c0_45 = arith.constant 0 : index
    %c0_46 = arith.constant 0 : index
    %58 = vector.load %arg19[%c0_45, %c0_46] : memref<1x8xf32, #tpu.memory_space<vmem>>, vector<1x8xf32>
    %59 = vector.broadcast %58 : vector<1x8xf32> to vector<56x8xf32>
    %60 = arith.addf %57, %59 : vector<56x8xf32>
    %61 = math.tanh %60 : vector<56x8xf32>
    %c0_47 = arith.constant 0 : index
    %c0_48 = arith.constant 0 : index
    %62 = vector.load %arg20[%c0_47, %c0_48] : memref<1x8xf32, #tpu.memory_space<vmem>>, vector<1x8xf32>
    %63 = vector.broadcast %62 : vector<1x8xf32> to vector<56x8xf32>
    %64 = arith.mulf %61, %63 : vector<56x8xf32>
    %cst_49 = arith.constant dense<0.000000e+00> : vector<56xf32>
    %65 = vector.multi_reduction <add>, %64, %cst_49 [1] : vector<56x8xf32> to vector<56xf32>
    %66 = vector.shape_cast %65 : vector<56xf32> to vector<56x1xf32>
    %c0_50 = arith.constant 0 : index
    %c0_51 = arith.constant 0 : index
    %67 = vector.load %arg21[%c0_50, %c0_51] : memref<1x1xf32, #tpu.memory_space<vmem>>, vector<1x1xf32>
    %68 = vector.broadcast %67 : vector<1x1xf32> to vector<56x1xf32>
    %69 = arith.addf %66, %68 : vector<56x1xf32>
    %70 = vector.extract_strided_slice %69 {offsets = [0, 0], sizes = [8, 1], strides = [1, 1]} : vector<56x1xf32> to vector<8x1xf32>
    %71 = vector.extract_strided_slice %69 {offsets = [8, 0], sizes = [8, 1], strides = [1, 1]} : vector<56x1xf32> to vector<8x1xf32>
    %72 = vector.extract_strided_slice %69 {offsets = [16, 0], sizes = [8, 1], strides = [1, 1]} : vector<56x1xf32> to vector<8x1xf32>
    %73 = vector.extract_strided_slice %69 {offsets = [24, 0], sizes = [8, 1], strides = [1, 1]} : vector<56x1xf32> to vector<8x1xf32>
    %74 = vector.extract_strided_slice %69 {offsets = [32, 0], sizes = [8, 1], strides = [1, 1]} : vector<56x1xf32> to vector<8x1xf32>
    %75 = vector.extract_strided_slice %69 {offsets = [40, 0], sizes = [8, 1], strides = [1, 1]} : vector<56x1xf32> to vector<8x1xf32>
    %76 = vector.extract_strided_slice %69 {offsets = [48, 0], sizes = [8, 1], strides = [1, 1]} : vector<56x1xf32> to vector<8x1xf32>
    %77 = tpu.concatenate %70, %71, %72, %73, %74, %75, %76 in 1 : vector<8x1xf32>, vector<8x1xf32>, vector<8x1xf32>, vector<8x1xf32>, vector<8x1xf32>, vector<8x1xf32>, vector<8x1xf32> -> vector<8x7xf32>
    %78 = arith.negf %77 : vector<8x7xf32>
    %79 = math.exp %78 : vector<8x7xf32>
    %cst_52 = arith.constant 1.000000e+00 : f32
    %80 = vector.broadcast %cst_52 : f32 to vector<8x7xf32>
    %81 = arith.addf %80, %79 : vector<8x7xf32>
    %82 = arith.divf %80, %81 : vector<8x7xf32>
    %c0_53 = arith.constant 0 : index
    %c0_54 = arith.constant 0 : index
    %83 = vector.load %arg22[%c0_53, %c0_54] : memref<8x7xf32, #tpu.memory_space<vmem>>, vector<8x7xf32>
    tpu.vector_store %arg22[%c0_53, %c0_54], %82 {strides = array<i32>} : memref<8x7xf32, #tpu.memory_space<vmem>>, vector<8x7xf32>,
    return
  }
  func.func @transform_0(%arg0: i32) -> (i32, i32) {
    %c0_i32 = arith.constant 0 : i32
    %c0_i32_0 = arith.constant 0 : i32
    return %arg0, %c0_i32 : i32, i32
  }
  func.func @transform_1(%arg0: i32) -> (i32, i32) {
    %c0_i32 = arith.constant 0 : i32
    %c0_i32_0 = arith.constant 0 : i32
    return %arg0, %c0_i32 : i32, i32
  }
  func.func @transform_2(%arg0: i32) -> (i32, i32) {
    %c0_i32 = arith.constant 0 : i32
    %c0_i32_0 = arith.constant 0 : i32
    %c0_i32_1 = arith.constant 0 : i32
    return %c0_i32, %c0_i32_0 : i32, i32
  }
  func.func @transform_3(%arg0: i32) -> (i32, i32) {
    %c0_i32 = arith.constant 0 : i32
    %c0_i32_0 = arith.constant 0 : i32
    %c0_i32_1 = arith.constant 0 : i32
    return %c0_i32, %c0_i32_0 : i32, i32
  }
  func.func @transform_4(%arg0: i32) -> (i32, i32) {
    %c0_i32 = arith.constant 0 : i32
    %c0_i32_0 = arith.constant 0 : i32
    %c0_i32_1 = arith.constant 0 : i32
    return %c0_i32, %c0_i32_0 : i32, i32
  }
  func.func @transform_5(%arg0: i32) -> (i32, i32) {
    %c0_i32 = arith.constant 0 : i32
    %c0_i32_0 = arith.constant 0 : i32
    %c0_i32_1 = arith.constant 0 : i32
    return %c0_i32, %c0_i32_0 : i32, i32
  }
  func.func @transform_6(%arg0: i32) -> (i32, i32) {
    %c0_i32 = arith.constant 0 : i32
    %c0_i32_0 = arith.constant 0 : i32
    %c0_i32_1 = arith.constant 0 : i32
    return %c0_i32, %c0_i32_0 : i32, i32
  }
  func.func @transform_7(%arg0: i32) -> (i32, i32) {
    %c0_i32 = arith.constant 0 : i32
    %c0_i32_0 = arith.constant 0 : i32
    %c0_i32_1 = arith.constant 0 : i32
    return %c0_i32, %c0_i32_0 : i32, i32
  }
  func.func @transform_8(%arg0: i32) -> (i32, i32) {
    %c0_i32 = arith.constant 0 : i32
    %c0_i32_0 = arith.constant 0 : i32
    %c0_i32_1 = arith.constant 0 : i32
    return %c0_i32, %c0_i32_0 : i32, i32
  }
  func.func @transform_9(%arg0: i32) -> (i32, i32) {
    %c0_i32 = arith.constant 0 : i32
    %c0_i32_0 = arith.constant 0 : i32
    %c0_i32_1 = arith.constant 0 : i32
    return %c0_i32, %c0_i32_0 : i32, i32
  }
  func.func @transform_10(%arg0: i32) -> (i32, i32) {
    %c0_i32 = arith.constant 0 : i32
    %c0_i32_0 = arith.constant 0 : i32
    %c0_i32_1 = arith.constant 0 : i32
    return %c0_i32, %c0_i32_0 : i32, i32
  }
  func.func @transform_11(%arg0: i32) -> (i32, i32) {
    %c0_i32 = arith.constant 0 : i32
    %c0_i32_0 = arith.constant 0 : i32
    %c0_i32_1 = arith.constant 0 : i32
    return %c0_i32, %c0_i32_0 : i32, i32
  }
  func.func @transform_12(%arg0: i32) -> (i32, i32) {
    %c0_i32 = arith.constant 0 : i32
    %c0_i32_0 = arith.constant 0 : i32
    %c0_i32_1 = arith.constant 0 : i32
    return %c0_i32, %c0_i32_0 : i32, i32
  }
  func.func @transform_13(%arg0: i32) -> (i32, i32) {
    %c0_i32 = arith.constant 0 : i32
    %c0_i32_0 = arith.constant 0 : i32
    %c0_i32_1 = arith.constant 0 : i32
    return %c0_i32, %c0_i32_0 : i32, i32
  }
  func.func @transform_14(%arg0: i32) -> (i32, i32) {
    %c0_i32 = arith.constant 0 : i32
    %c0_i32_0 = arith.constant 0 : i32
    %c0_i32_1 = arith.constant 0 : i32
    return %c0_i32, %c0_i32_0 : i32, i32
  }
  func.func @transform_15(%arg0: i32) -> (i32, i32) {
    %c0_i32 = arith.constant 0 : i32
    %c0_i32_0 = arith.constant 0 : i32
    %c0_i32_1 = arith.constant 0 : i32
    return %c0_i32, %c0_i32_0 : i32, i32
  }
  func.func @transform_16(%arg0: i32) -> (i32, i32) {
    %c0_i32 = arith.constant 0 : i32
    %c0_i32_0 = arith.constant 0 : i32
    %c0_i32_1 = arith.constant 0 : i32
    return %c0_i32, %c0_i32_0 : i32, i32
  }
  func.func @transform_17(%arg0: i32) -> (i32, i32) {
    %c0_i32 = arith.constant 0 : i32
    %c0_i32_0 = arith.constant 0 : i32
    %c0_i32_1 = arith.constant 0 : i32
    return %c0_i32, %c0_i32_0 : i32, i32
  }
  func.func @transform_18(%arg0: i32) -> (i32, i32) {
    %c0_i32 = arith.constant 0 : i32
    %c0_i32_0 = arith.constant 0 : i32
    %c0_i32_1 = arith.constant 0 : i32
    return %c0_i32, %c0_i32_0 : i32, i32
  }
  func.func @transform_19(%arg0: i32) -> (i32, i32) {
    %c0_i32 = arith.constant 0 : i32
    %c0_i32_0 = arith.constant 0 : i32
    %c0_i32_1 = arith.constant 0 : i32
    return %c0_i32, %c0_i32_0 : i32, i32
  }
  func.func @transform_20(%arg0: i32) -> (i32, i32) {
    %c0_i32 = arith.constant 0 : i32
    %c0_i32_0 = arith.constant 0 : i32
    %c0_i32_1 = arith.constant 0 : i32
    return %c0_i32, %c0_i32_0 : i32, i32
  }
  func.func @transform_21(%arg0: i32) -> (i32, i32) {
    %c0_i32 = arith.constant 0 : i32
    %c0_i32_0 = arith.constant 0 : i32
    return %arg0, %c0_i32 : i32, i32
  }
  func.func @transform_22(%arg0: i32) -> (i32, i32) {
    %c0_i32 = arith.constant 0 : i32
    %c0_i32_0 = arith.constant 0 : i32
    return %arg0, %c0_i32 : i32, i32
  }
}

</mosaic_0001>

<bundles_post_ra>
// kernel: tpu_custom_call.1
= control target key start
LH: loop header
LB: loop body
LE: loop exit
PB: predicated region body
PF: predicated region fallthrough
CT: control target
= control target key end

     0   :  { %s2437_s0 = inlined_call_operand.hbm [shape: f32[8,16], index: 0, kind: input, shape index: {}]   ;;  %s2438_s1 = inlined_call_operand.hbm [shape: f32[8,24], index: 1, kind: input, shape index: {}]   ;;  %s2439_s2 = inlined_call_operand.hbm [shape: f32[16,48], index: 2, kind: input, shape index: {}]   ;;  %s2440_s3 = inlined_call_operand.hbm [shape: f32[1,48], index: 3, kind: input, shape index: {}]   ;;  %s2441_s4 = inlined_call_operand.vmem [shape: f32[48,48], index: 4, kind: input, shape index: {}]   ;;  %s2442_s5 = inlined_call_operand.hbm [shape: f32[1,48], index: 5, kind: input, shape index: {}]   ;;  %s2443_s6 = inlined_call_operand.vmem [shape: f32[48,48], index: 6, kind: input, shape index: {}]   ;;  %s2444_s7 = inlined_call_operand.hbm [shape: f32[1,48], index: 7, kind: input, shape index: {}]   ;;  %s2445_s8 = inlined_call_operand.vmem [shape: f32[48,24], index: 8, kind: input, shape index: {}]   ;;  %s2446_s9 = inlined_call_operand.hbm [shape: f32[1,24], index: 9, kind: input, shape index: {}]   ;;  %s2447_s10 = inlined_call_operand.vmem [shape: f32[24,32], index: 10, kind: input, shape index: {}]   ;;  %s2448_s11 = inlined_call_operand.hbm [shape: f32[1,32], index: 11, kind: input, shape index: {}]   ;;  %s2449_s12 = inlined_call_operand.vmem [shape: f32[16,16], index: 12, kind: input, shape index: {}]   ;;  %s2450_s13 = inlined_call_operand.hbm [shape: f32[8,16], index: 13, kind: input, shape index: {}]   ;;  %s2451_s14 = inlined_call_operand.hbm [shape: f32[1,16], index: 14, kind: input, shape index: {}]   ;;  %s2452_s15 = inlined_call_operand.vmem [shape: f32[16,16], index: 15, kind: input, shape index: {}]   ;;  %s2453_s16 = inlined_call_operand.hbm [shape: f32[1,16], index: 16, kind: input, shape index: {}]   ;;  %s2454_s17 = inlined_call_operand.vmem [shape: f32[16,8], index: 17, kind: input, shape index: {}]   ;;  %s2455_s18 = inlined_call_operand.vmem [shape: f32[1,8], index: 18, kind: input, shape index: {}]   ;;  %s2456_s19 = inlined_call_operand.vmem [shape: f32[1,8], index: 19, kind: input, shape index: {}]   ;;  %s2457_s20 = inlined_call_operand.<no memory space> [shape: f32[1,1], index: 20, kind: input, shape index: {}]   ;;  %s2458_s21 = inlined_call_operand.hbm [shape: f32[8,7], index: 21, kind: output, shape index: {0}]   ;;  %s2459_s22 = inlined_call_operand.hbm [shape: f32[8,32], index: 22, kind: output, shape index: {1}]  }
   0x1   :  { %2467 = sst [smem:[#allocation32_spill]] %s2437_s0  ;;  %v28_v0 = vstv %s2457_s20 }
   0x2   :  { %2468 = sst [smem:[#allocation33_spill]] %s2438_s1  ;;  %29 = vst [vmem:[#allocation2] sm:$0x1] %v28_v0 }
   0x3   :  { %2469 = sst [smem:[#allocation34_spill]] %s2439_s2 }
   0x4   :  { %2470 = sst [smem:[#allocation35_spill]] %s2440_s3 }
   0x5   :  { %2471 = sst [smem:[#allocation36_spill]] %s2441_s4 }
   0x6   :  { %2472 = sst [smem:[#allocation37_spill]] %s2442_s5 }
   0x7   :  { %2473 = sst [smem:[#allocation38_spill]] %s2443_s6 }
   0x8   :  { %30 = vsyncpa [#allocation4], 0 }
   0x9   :  { %31 = vsyncpa [#allocation7], 0 }
   0xa   :  { %32 = vsyncpa [#allocation10], 0 }
   0xb   :  { %33 = vsyncpa [#allocation13], 0 }
   0xc   :  { %34 = vsyncpa [#allocation16], 0 }
   0xd   :  { %35 = vsyncpa [#allocation19], 0 }
   0xe   :  { %36 = vsyncpa [#allocation5], 0 }
   0xf   :  { %37 = vsyncpa [#allocation23], 0  ;;  %s1920_s29 = smov [#allocation6]   ;;  %s1921_s4 = smov [#allocation9]  }
  0x10   :  { %s54_s30 = sshll.u32 %s1920_s29, 4  ;;  %s76_s0 = sshll.u32 %s1921_s4, 4  ;;  %s55_s30 = int_to_ptr.vmem [resolvable:$true] %s54_s30  ;;  %s77_s0 = int_to_ptr.vmem [resolvable:$true] %s76_s0 }
  0x11   :  { %s2474_s5 = sld [smem:[#allocation33_spill]] }
  0x17   :  { %s1618_s24 = scalar_lea.hbm %s2474_s5, 128 }
  0x18   :  { %p1619_p0 = scmp.ne.s32.totalorder %s2474_s5, %s1618_s24  ;;  %p1622_p1 = scmp.lt.u32.totalorder %s1618_s24, %s2474_s5 }
  0x1a   :  { %p1624_p2 = pnand %p1622_p1, %p1619_p0 }
  0x1c   :  { %1627 = shalt.err (!%p1624_p2)
}
  0x1d   :  { %s1628_s2 = scalar_lea.vmem %s55_s30, 128  ;;  %p1633_p4 = scmp.lt.s32.totalorder %s55_s30, %s55_s30 }
  0x1e   :  { %p1629_p3 = scmp.ne.s32.totalorder %s55_s30, %s1628_s2  ;;  %p1634_p5 = scmp.lt.s32.totalorder %s1628_s2, %s1628_s2 }
  0x20   :  { %p1635_p6 = por %p1634_p5, %p1633_p4 }
  0x22   :  { %p1636_p7 = pnand %p1635_p6, %p1629_p3 }
  0x24   :  { %1639 = shalt.err (!%p1636_p7)
}
  0x25   :  { %57 = dma.hbm_to_vmem [thread:$0]  %s2474_s5, 128, %s55_s30, [#allocation7]  }
  0x26   :  { %s2475_s4 = sld [smem:[#allocation35_spill]] }
  0x2c   :  { %s1640_s23 = scalar_lea.hbm %s2475_s4, 16 }
  0x2d   :  { %p1641_p8 = scmp.ne.s32.totalorder %s2475_s4, %s1640_s23  ;;  %p1644_p9 = scmp.lt.u32.totalorder %s1640_s23, %s2475_s4 }
  0x2f   :  { %p1646_p10 = pnand %p1644_p9, %p1641_p8 }
  0x31   :  { %1649 = shalt.err (!%p1646_p10)
}
  0x32   :  { %s1650_s25 = scalar_lea.vmem %s77_s0, 16  ;;  %s1654_s26 = scalar_lea.vmem %s77_s0, 32 }
  0x33   :  { %p1651_p11 = scmp.ne.s32.totalorder %s77_s0, %s1650_s25  ;;  %p1655_p12 = scmp.lt.s32.totalorder %s77_s0, %s77_s0 }
  0x34   :  { %p1656_p13 = scmp.lt.s32.totalorder %s1654_s26, %s1650_s25 }
  0x36   :  { %p1657_p0 = por %p1656_p13, %p1655_p12 }
  0x38   :  { %p1658_p1 = pnand %p1657_p0, %p1651_p11 }
  0x3a   :  { %1661 = shalt.err (!%p1658_p1)
}
  0x3b   :  { %79 = dma.hbm_to_vmem [thread:$0]  %s2475_s4, 16, %s77_s0, [#allocation10]  }
  0x3c   :  { %s1922_s2 = smov [#allocation12]   ;;  %s1923_s3 = smov [#allocation15]  }
  0x3d   :  { %s100_s27 = sshll.u32 %s1922_s2, 4  ;;  %s124_s28 = sshll.u32 %s1923_s3, 4  ;;  %s101_s27 = int_to_ptr.vmem [resolvable:$true] %s100_s27  ;;  %s125_s28 = int_to_ptr.vmem [resolvable:$true] %s124_s28 }
  0x3e   :  { %s1662_s1 = scalar_lea.hbm %s2444_s7, 16 }
  0x3f   :  { %p1663_p2 = scmp.ne.s32.totalorder %s2444_s7, %s1662_s1  ;;  %p1666_p3 = scmp.lt.u32.totalorder %s1662_s1, %s2444_s7 }
  0x41   :  { %p1668_p4 = pnand %p1666_p3, %p1663_p2 }
  0x43   :  { %1671 = shalt.err (!%p1668_p4)
}
  0x44   :  { %s1672_s0 = scalar_lea.vmem %s101_s27, 16  ;;  %s1676_s4 = scalar_lea.vmem %s101_s27, 32 }
  0x45   :  { %p1673_p5 = scmp.ne.s32.totalorder %s101_s27, %s1672_s0  ;;  %p1677_p6 = scmp.lt.s32.totalorder %s101_s27, %s101_s27 }
  0x46   :  { %p1678_p7 = scmp.lt.s32.totalorder %s1676_s4, %s1672_s0 }
  0x48   :  { %p1679_p8 = por %p1678_p7, %p1677_p6 }
  0x4a   :  { %p1680_p9 = pnand %p1679_p8, %p1673_p5 }
  0x4c   :  { %1683 = shalt.err (!%p1680_p9)
}
  0x4d   :  { %103 = dma.hbm_to_vmem [thread:$0]  %s2444_s7, 16, %s101_s27, [#allocation13]  }
  0x4e   :  { %s1684_s3 = scalar_lea.hbm %s2448_s11, 16 }
  0x4f   :  { %p1685_p10 = scmp.ne.s32.totalorder %s2448_s11, %s1684_s3  ;;  %p1688_p11 = scmp.lt.u32.totalorder %s1684_s3, %s2448_s11 }
  0x51   :  { %p1690_p12 = pnand %p1688_p11, %p1685_p10 }
  0x53   :  { %1693 = shalt.err (!%p1690_p12)
}
  0x54   :  { %s1694_s24 = scalar_lea.vmem %s125_s28, 16  ;;  %s1698_s6 = scalar_lea.vmem %s125_s28, 32 }
  0x55   :  { %p1695_p13 = scmp.ne.s32.totalorder %s125_s28, %s1694_s24  ;;  %p1699_p0 = scmp.lt.s32.totalorder %s125_s28, %s125_s28 }
  0x56   :  { %p1700_p1 = scmp.lt.s32.totalorder %s1698_s6, %s1694_s24 }
  0x58   :  { %p1701_p2 = por %p1700_p1, %p1699_p0 }
  0x5a   :  { %p1702_p3 = pnand %p1701_p2, %p1695_p13 }
  0x5c   :  { %1705 = shalt.err (!%p1702_p3)
}
  0x5d   :  { %127 = dma.hbm_to_vmem [thread:$0]  %s2448_s11, 16, %s125_s28, [#allocation16]  }
  0x5e   :  { %s1924_s25 = smov [#allocation18]   ;;  %s1925_s4 = smov [#allocation3]  }
  0x5f   :  { %s146_s0 = sshll.u32 %s1924_s25, 4  ;;  %s44_s26 = sshll.u32 %s1925_s4, 4  ;;  %s147_s0 = int_to_ptr.vmem [resolvable:$true] %s146_s0  ;;  %s45_s26 = int_to_ptr.vmem [resolvable:$true] %s44_s26 }
  0x60   :  { %s1706_s2 = scalar_lea.hbm %s2451_s14, 16 }
  0x61   :  { %p1707_p4 = scmp.ne.s32.totalorder %s2451_s14, %s1706_s2  ;;  %p1710_p5 = scmp.lt.u32.totalorder %s1706_s2, %s2451_s14 }
  0x63   :  { %p1712_p6 = pnand %p1710_p5, %p1707_p4 }
  0x65   :  { %1715 = shalt.err (!%p1712_p6)
}
  0x66   :  { %s1716_s11 = scalar_lea.vmem %s147_s0, 16  ;;  %s1720_s28 = scalar_lea.vmem %s147_s0, 32 }
  0x67   :  { %p1717_p7 = scmp.ne.s32.totalorder %s147_s0, %s1716_s11  ;;  %p1721_p8 = scmp.lt.s32.totalorder %s147_s0, %s147_s0 }
  0x68   :  { %p1722_p9 = scmp.lt.s32.totalorder %s1720_s28, %s1716_s11 }
  0x6a   :  { %p1723_p10 = por %p1722_p9, %p1721_p8 }
  0x6c   :  { %p1724_p11 = pnand %p1723_p10, %p1717_p7 }
  0x6e   :  { %1727 = shalt.err (!%p1724_p11)
}
  0x6f   :  { %149 = dma.hbm_to_vmem [thread:$0]  %s2451_s14, 16, %s147_s0, [#allocation19]  }
  0x70   :  { %s2476_s27 = sld [smem:[#allocation32_spill]] }
  0x76   :  { %s1728_s25 = scalar_lea.hbm %s2476_s27, 128 }
  0x77   :  { %p1729_p12 = scmp.ne.s32.totalorder %s2476_s27, %s1728_s25  ;;  %p1732_p13 = scmp.lt.u32.totalorder %s1728_s25, %s2476_s27 }
  0x79   :  { %p1734_p0 = pnand %p1732_p13, %p1729_p12 }
  0x7b   :  { %1737 = shalt.err (!%p1734_p0)
}
  0x7c   :  { %s1738_s3 = scalar_lea.vmem %s45_s26, 128  ;;  %p1743_p2 = scmp.lt.s32.totalorder %s45_s26, %s45_s26 }
  0x7d   :  { %p1739_p1 = scmp.ne.s32.totalorder %s45_s26, %s1738_s3  ;;  %p1744_p3 = scmp.lt.s32.totalorder %s1738_s3, %s1738_s3 }
  0x7f   :  { %p1745_p4 = por %p1744_p3, %p1743_p2 }
  0x81   :  { %p1746_p5 = pnand %p1745_p4, %p1739_p1 }
  0x83   :  { %1749 = shalt.err (!%p1746_p5)
}
  0x84   :  { %47 = dma.hbm_to_vmem [thread:$0]  %s2476_s27, 128, %s45_s26, [#allocation4]  }
  0x85   :  { %s1926_s29 = smov [#allocation8]   ;;  %s2477_s28 = sld [smem:[#allocation34_spill]] }
  0x86   :  { %s63_s23 = sshll.u32 %s1926_s29, 4  ;;  %s64_s23 = int_to_ptr.vmem [resolvable:$true] %s63_s23 }
  0x8b   :  { %s1750_s20 = scalar_lea.hbm %s2477_s28, 256 }
  0x8c   :  { %p1751_p6 = scmp.ne.s32.totalorder %s2477_s28, %s1750_s20  ;;  %p1754_p7 = scmp.lt.u32.totalorder %s1750_s20, %s2477_s28 }
  0x8e   :  { %p1756_p8 = pnand %p1754_p7, %p1751_p6 }
  0x90   :  { %1759 = shalt.err (!%p1756_p8)
}
  0x91   :  { %s1760_s4 = scalar_lea.vmem %s64_s23, 256  ;;  %p1765_p10 = scmp.lt.s32.totalorder %s64_s23, %s64_s23 }
  0x92   :  { %p1761_p9 = scmp.ne.s32.totalorder %s64_s23, %s1760_s4  ;;  %p1766_p11 = scmp.lt.s32.totalorder %s1760_s4, %s1760_s4 }
  0x94   :  { %p1767_p12 = por %p1766_p11, %p1765_p10 }
  0x96   :  { %p1768_p13 = pnand %p1767_p12, %p1761_p9 }
  0x98   :  { %1771 = shalt.err (!%p1768_p13)
}
  0x99   :  { %s1927_s26 = smov 128   ;;  %s1928_s27 = smov 8  }
  0x9a   :  { %69 = dma.hbm_to_vmem [thread:$0]  %s2477_s28, 256, %s64_s23, [#allocation7], %s1927_s26, %s1927_s26, %s1928_s27  }
  0x9b   :  { %s1929_s2 = smov [#allocation11]   ;;  %s1930_s14 = smov [#allocation14]  }
  0x9c   :  { %s88_s3 = sshll.u32 %s1929_s2, 4  ;;  %s112_s0 = sshll.u32 %s1930_s14, 4  ;;  %s89_s3 = int_to_ptr.vmem [resolvable:$true] %s88_s3  ;;  %s113_s0 = int_to_ptr.vmem [resolvable:$true] %s112_s0 }
  0x9d   :  { %s2478_s11 = sld [smem:[#allocation37_spill]] }
  0xa3   :  { %s1772_s20 = scalar_lea.hbm %s2478_s11, 16 }
  0xa4   :  { %p1773_p0 = scmp.ne.s32.totalorder %s2478_s11, %s1772_s20  ;;  %p1776_p1 = scmp.lt.u32.totalorder %s1772_s20, %s2478_s11 }
  0xa6   :  { %p1778_p2 = pnand %p1776_p1, %p1773_p0 }
  0xa8   :  { %1781 = shalt.err (!%p1778_p2)
}
  0xa9   :  { %s1782_s23 = scalar_lea.vmem %s89_s3, 16  ;;  %s1786_s28 = scalar_lea.vmem %s89_s3, 32 }
  0xaa   :  { %p1783_p3 = scmp.ne.s32.totalorder %s89_s3, %s1782_s23  ;;  %p1787_p4 = scmp.lt.s32.totalorder %s89_s3, %s89_s3 }
  0xab   :  { %p1788_p5 = scmp.lt.s32.totalorder %s1786_s28, %s1782_s23 }
  0xad   :  { %p1789_p6 = por %p1788_p5, %p1787_p4 }
  0xaf   :  { %p1790_p7 = pnand %p1789_p6, %p1783_p3 }
  0xb1   :  { %1793 = shalt.err (!%p1790_p7)
}
  0xb2   :  { %91 = dma.hbm_to_vmem [thread:$0]  %s2478_s11, 16, %s89_s3, [#allocation10]  }
  0xb3   :  { %s1794_s5 = scalar_lea.hbm %s2446_s9, 16 }
  0xb4   :  { %p1795_p8 = scmp.ne.s32.totalorder %s2446_s9, %s1794_s5  ;;  %p1798_p9 = scmp.lt.u32.totalorder %s1794_s5, %s2446_s9 }
  0xb6   :  { %p1800_p10 = pnand %p1798_p9, %p1795_p8 }
  0xb8   :  { %1803 = shalt.err (!%p1800_p10)
}
  0xb9   :  { %s1804_s20 = scalar_lea.vmem %s113_s0, 16  ;;  %s1808_s24 = scalar_lea.vmem %s113_s0, 32 }
  0xba   :  { %p1805_p11 = scmp.ne.s32.totalorder %s113_s0, %s1804_s20  ;;  %p1809_p12 = scmp.lt.s32.totalorder %s113_s0, %s113_s0 }
  0xbb   :  { %p1810_p13 = scmp.lt.s32.totalorder %s1808_s24, %s1804_s20 }
  0xbd   :  { %p1811_p0 = por %p1810_p13, %p1809_p12 }
  0xbf   :  { %p1812_p1 = pnand %p1811_p0, %p1805_p11 }
  0xc1   :  { %1815 = shalt.err (!%p1812_p1)
}
  0xc2   :  { %115 = dma.hbm_to_vmem [thread:$0]  %s2446_s9, 16, %s113_s0, [#allocation13]  }
  0xc3   :  { %s1931_s6 = smov [#allocation17]   ;;  %s1932_s25 = smov [#allocation20]  }
  0xc4   :  { %s136_s7 = sshll.u32 %s1931_s6, 4  ;;  %s158_s23 = sshll.u32 %s1932_s25, 4  ;;  %s137_s7 = int_to_ptr.vmem [resolvable:$true] %s136_s7  ;;  %s159_s23 = int_to_ptr.vmem [resolvable:$true] %s158_s23 }
  0xc5   :  { %s1816_s26 = scalar_lea.hbm %s2450_s13, 128 }
  0xc6   :  { %p1817_p2 = scmp.ne.s32.totalorder %s2450_s13, %s1816_s26  ;;  %p1820_p3 = scmp.lt.u32.totalorder %s1816_s26, %s2450_s13 }
  0xc8   :  { %p1822_p4 = pnand %p1820_p3, %p1817_p2 }
  0xca   :  { %1825 = shalt.err (!%p1822_p4)
}
  0xcb   :  { %s1826_s9 = scalar_lea.vmem %s137_s7, 128  ;;  %p1831_p6 = scmp.lt.s32.totalorder %s137_s7, %s137_s7 }
  0xcc   :  { %p1827_p5 = scmp.ne.s32.totalorder %s137_s7, %s1826_s9  ;;  %p1832_p7 = scmp.lt.s32.totalorder %s1826_s9, %s1826_s9 }
  0xce   :  { %p1833_p8 = por %p1832_p7, %p1831_p6 }
  0xd0   :  { %p1834_p9 = pnand %p1833_p8, %p1827_p5 }
  0xd2   :  { %1837 = shalt.err (!%p1834_p9)
}
  0xd3   :  { %139 = dma.hbm_to_vmem [thread:$0]  %s2450_s13, 128, %s137_s7, [#allocation16]  }
  0xd4   :  { %s1838_s20 = scalar_lea.hbm %s2453_s16, 16 }
  0xd5   :  { %p1839_p10 = scmp.ne.s32.totalorder %s2453_s16, %s1838_s20  ;;  %p1842_p11 = scmp.lt.u32.totalorder %s1838_s20, %s2453_s16 }
  0xd7   :  { %p1844_p12 = pnand %p1842_p11, %p1839_p10 }
  0xd9   :  { %1847 = shalt.err (!%p1844_p12)
}
  0xda   :  { %s1848_s25 = scalar_lea.vmem %s159_s23, 16  ;;  %s1852_s28 = scalar_lea.vmem %s159_s23, 32 }
  0xdb   :  { %p1849_p13 = scmp.ne.s32.totalorder %s159_s23, %s1848_s25  ;;  %p1853_p0 = scmp.lt.s32.totalorder %s159_s23, %s159_s23 }
  0xdc   :  { %p1854_p1 = scmp.lt.s32.totalorder %s1852_s28, %s1848_s25 }
  0xde   :  { %p1855_p2 = por %p1854_p1, %p1853_p0 }
  0xe0   :  { %p1856_p3 = pnand %p1855_p2, %p1849_p13 }
  0xe2   :  { %1859 = shalt.err (!%p1856_p3)
}
  0xe3   :  { %161 = dma.hbm_to_vmem [thread:$0]  %s2453_s16, 16, %s159_s23, [#allocation19]  }
  0xe4   :  { %1904 = dma.done.wait [#allocation4], 128  }
  0xe5   :  { %1905 = vsyncadd [#allocation4], 4294967168 }
  0xe6   :  { %1906 = dma.done.wait [#allocation7], 384  }
  0xe7   :  { %1907 = vsyncadd [#allocation7], 4294966912 }
  0xe8   :  { %1908 = dma.done.wait [#allocation10], 32  }
  0xe9   :  { %1909 = vsyncadd [#allocation10], 4294967264 }
  0xea   :  { %1910 = dma.done.wait [#allocation13], 32  }
  0xeb   :  { %1911 = vsyncadd [#allocation13], 4294967264 }
  0xec   :  { %1912 = dma.done.wait [#allocation16], 144  }
  0xed   :  { %1913 = vsyncadd [#allocation16], 4294967152 }
  0xee   :  { %1914 = dma.done.wait [#allocation19], 32  }
  0xef   :  { %1915 = vsyncadd [#allocation19], 4294967264  ;;  %v1933_v1 = vmov 0.0|0.0   ;;  %vm1934_vm0 = vmmov 0   ;;  %v1935_v2 = vmov 0.0   ;;  %v204_v3 = vld [vmem:[#allocation8] sm:$0xff] }
  0xf0   :  { %1495 = vmatprep.subr.bf16.mxu0 %v1933_v1  ;;  %1358 = vmatprep.mubr.msk.f32.mxu0 %vm1934_vm0, %v1935_v2  ;;  %v205_v4 = vld [vmem:[#allocation8 + $0x8] sm:$0xff]  ;;  %v2203_v6 = vld [vmem:[#allocation3] sm:$0xff]  ;;  %vm238_vm1 = vcmask 130048   ;;  %s2479_s4 = sld [smem:[#allocation36_spill]]  ;;  %vm319_vm2 = vcmask 392192   ;;  %s2480_s3 = sld [smem:[#allocation38_spill]] }
  0xf1   :  { %1516 = vmatprep.subr.bf16.mxu1 %v1933_v1  ;;  %1403 = vmatprep.mubr.msk.f32.mxu1 %vm1934_vm0, %v1935_v2  ;;  %v1496_v5 = vpack.c.bf16 %v205_v4, %v204_v3  ;;  %v1259_v16 = vld [vmem:[#allocation9] ss:$0 sm:$0xff]  ;;  %v1261_v30 = vld [vmem:[#allocation11] ss:$0 sm:$0xff]  ;;  %v222_v36 = vld [vmem:[%s2445_s8 + $0x8] sm:$0xff]  ;;  %s1936_s7 = smov 120  }
  0xf2   :  { %v221_v35 = vld [vmem:[%s2445_s8] sm:$0xff]  ;;  %v223_v38 = vld [vmem:[%s2445_s8 + $0x10] sm:$0xff]  ;;  %v224_v39 = vld [vmem:[%s2445_s8 + $0x18] sm:$0xff]  ;;  %vm729_vm3 = vcmask 64512   ;;  %s1937_s16 = smov 112   ;;  %vm560_vm4 = vcmask 195584  }
  0xf3   :  { %1497 = vmatpush3.bf16.msra.mxu0 %v1496_v5  ;;  %v1517_v37 = vpack.c.bf16 %v222_v36, %v221_v35  ;;  %v1520_v40 = vpack.c.bf16 %v224_v39, %v223_v38  ;;  %v225_v41 = vld [vmem:[%s2445_s8 + $0x20] sm:$0xff]  ;;  %v226_v42 = vld [vmem:[%s2445_s8 + $0x28] sm:$0xff]  ;;  %v230_v52 = vld [vmem:[%s2447_s10 + $0x10] sm:$0xff]  ;;  %vm634_vm5 = vcmask 261120   ;;  %s1938_s2 = smov 104   ;;  %s1941_s24 = smov 2  }
  0xf4   :  { %1498 = vmatprep.subr.bf16.mxu0 %v1933_v1  ;;  %v1523_v43 = vpack.c.bf16 %v226_v42, %v225_v41  ;;  %v1263_v44 = vld [vmem:[#allocation12] ss:$0 sm:$0xff]  ;;  %v229_v50 = vld [vmem:[%s2447_s10 + $0x8] sm:$0xff]  ;;  %v1265_v55 = vld [vmem:[#allocation14] ss:$0 sm:$0xff]  ;;  %s1943_s11 = smov 5  }
  0xf5   :  { %1518 = vmatpush3.bf16.msra.mxu1 %v1517_v37  ;;  %v228_v49 = vld [vmem:[%s2447_s10] sm:$0xff]  ;;  %v715_v53 = vld [vmem:[#allocation6] sm:$0xff]  ;;  %v2360_v35 = vld [vmem:[#allocation20] ss:$0 sm:$0xff]  ;;  %s1944_s8 = smov 6   ;;  %s1945_s6 = smov [#allocation22]  }
  0xf6   :  { %1359 = vmatmul.mubr.msk.f32.vlgmr.msra.gmra.mrb[0].mxu0 %vm238_vm1, %v2203_v6  ;;  %v207_v7 = vld [vmem:[%s2479_s4] sm:$0xff]  ;;  %v208_v8 = vld [vmem:[%s2479_s4 + $0x8] sm:$0xff]  ;;  %v209_v10 = vld [vmem:[%s2479_s4 + $0x10] sm:$0xff]  ;;  %1519 = vmatprep.subr.bf16.mxu1 %v1933_v1  ;;  %v1526_v51 = vpack.c.bf16 %v229_v50, %v228_v49  ;;  %s1241_s25 = sshll.u32 %s1945_s6, 4  ;;  %s1242_s25 = int_to_ptr.vmem [resolvable:$true] %s1241_s25 }
  0xf7   :  { %1373 = vmatprep.mubr.msk.f32.mxu0 %vm1934_vm0, %v1935_v2  ;;  %v1499_v9 = vpack.c.bf16 %v208_v8, %v207_v7  ;;  %v210_v11 = vld [vmem:[%s2479_s4 + $0x18] sm:$0xff]  ;;  %v211_v13 = vld [vmem:[%s2479_s4 + $0x20] sm:$0xff]  ;;  %v212_v14 = vld [vmem:[%s2479_s4 + $0x28] sm:$0xff]  ;;  %717 = vrot.lane.b32.xlu0 %v715_v53, %s1936_s7  ;;  %s1860_s28 = scalar_lea.vmem %s1242_s25, 128  ;;  %p1865_p5 = scmp.lt.s32.totalorder %s1242_s25, %s1242_s25 }
  0xf8   :  { %v1502_v12 = vpack.c.bf16 %v210_v11, %v209_v10  ;;  %v1505_v15 = vpack.c.bf16 %v212_v14, %v211_v13  ;;  %v214_v21 = vld [vmem:[%s2480_s3] sm:$0xff]  ;;  %v215_v22 = vld [vmem:[%s2480_s3 + $0x8] sm:$0xff]  ;;  %v216_v24 = vld [vmem:[%s2480_s3 + $0x10] sm:$0xff]  ;;  %p1861_p4 = scmp.ne.s32.totalorder %s1242_s25, %s1860_s28  ;;  %p1866_p6 = scmp.lt.s32.totalorder %s1860_s28, %s1860_s28 }
  0xf9   :  { %1500 = vmatpush3.bf16.msra.mxu0 %v1499_v9  ;;  %v1508_v23 = vpack.c.bf16 %v215_v22, %v214_v21  ;;  %v217_v25 = vld [vmem:[%s2480_s3 + $0x18] sm:$0xff]  ;;  %v218_v27 = vld [vmem:[%s2480_s3 + $0x20] sm:$0xff]  ;;  %v219_v28 = vld [vmem:[%s2480_s3 + $0x28] sm:$0xff]  ;;  %1521 = vmatpush3.bf16.msra.mxu1 %v1520_v40  ;;  %s1942_s3 = smov 4  }
  0xfa   :  { %1501 = vmatprep.subr.bf16.mxu0 %v1933_v1  ;;  %v1511_v26 = vpack.c.bf16 %v217_v25, %v216_v24  ;;  %v1514_v29 = vpack.c.bf16 %v219_v28, %v218_v27  ;;  %1522 = vmatprep.subr.bf16.mxu1 %v1933_v1  ;;  %v728_v54 = vld [vmem:[#allocation17] sm:$0xff]  ;;  %v636_v61 = vld [vmem:[%s2449_s12] sm:$0xff]  ;;  %v1267_v3 = vld [vmem:[#allocation15] ss:$0 sm:$0xff]  ;;  %p1867_p7 = por %p1866_p6, %p1865_p5 }
  0xfb   :  { %719 = vrot.lane.b32.xlu0 %v715_v53, %s1937_s16  ;;  %v637_v62 = vld [vmem:[%s2449_s12 + $0x8] sm:$0xff]  ;;  %v858_v5 = vld [vmem:[%s2452_s15] sm:$0xff]  ;;  %v1269_v13 = vld [vmem:[#allocation18] ss:$0 sm:$0xff] }
  0xfc   :  { %v1529_v63 = vpack.c.bf16 %v637_v62, %v636_v61  ;;  %v859_v7 = vld [vmem:[%s2452_s15 + $0x8] sm:$0xff]  ;;  %p1868_p8 = pnand %p1867_p7, %p1861_p4 }
  0xfd   :  { %1503 = vmatpush3.bf16.msra.mxu0 %v1502_v12  ;;  %1524 = vmatpush3.bf16.msra.mxu1 %v1523_v43  ;;  %v1532_v9 = vpack.c.bf16 %v859_v7, %v858_v5 }
  0xfe   :  { %1504 = vmatprep.subr.bf16.mxu0 %v1933_v1  ;;  %1422 = vmatprep.subr.mxu1 %v1935_v2 }
 0x101   :  { %1506 = vmatpush3.bf16.msra.mxu0 %v1505_v15 }
 0x102   :  { %1507 = vmatprep.subr.bf16.mxu0 %v1933_v1 }
 0x169   :  { %v718_v59 = vpop.permute.xlu0 %717 }
 0x16d   :  { %v720_v60 = vpop.permute.xlu0 %719 }
 0x1c9   :  { %v308_v17 = vpop.f32.mrb[0].mxu0 }
 0x1ca   :  { %v309_v18 = vadd.f32 %v1259_v16, %v308_v17  ;;  %v1360_v19 = vpop.f32.mrb[1].mxu0 }
 0x1cc   :  { %1564 = vtanh.f32 %v309_v18 }
 0x1d6   :  { %v1565_v20 = vpop.eup %1564 }
 0x1d7   :  { %1374 = vmatmul.mubr.msk.f32.vlgmr.msra.gmra.mrb[2].mxu0 %vm319_vm2, %v1565_v20 }
 0x1d8   :  { %1388 = vmatprep.mubr.msk.f32.mxu0 %vm1934_vm0, %v1935_v2  ;;  %1509 = vmatpush3.bf16.msra.mxu0 %v1508_v23 }
 0x1d9   :  { %1510 = vmatprep.subr.bf16.mxu0 %v1933_v1 }
 0x1dc   :  { %1512 = vmatpush3.bf16.msra.mxu0 %v1511_v26 }
 0x1dd   :  { %1513 = vmatprep.subr.bf16.mxu0 %v1933_v1 }
 0x1e0   :  { %1515 = vmatpush3.bf16.msra.mxu0 %v1514_v29 }
 0x1e1   :  { %1525 = vmatprep.subr.bf16.mxu0 %v1933_v1 }
 0x2aa   :  { %v389_v31 = vpop.f32.mrb[2].mxu0 }
 0x2ab   :  { %v390_v32 = vadd.f32 %v1261_v30, %v389_v31  ;;  %v1375_v33 = vpop.f32.mrb[3].mxu0  ;;  %v995_v31 = vld [vmem:[%s2454_s17] sm:$0xff] }
 0x2ad   :  { %1566 = vtanh.f32 %v390_v32  ;;  %v996_v32 = vld [vmem:[%s2454_s17 + $0x8] sm:$0xff] }
 0x2ae   :  { %v1535_v33 = vpack.c.bf16 %v996_v32, %v995_v31 }
 0x2b7   :  { %v1567_v34 = vpop.eup %1566 }
 0x2b8   :  { %1389 = vmatmul.mubr.msk.f32.vlgmr.msra.gmra.mrb[4].mxu0 %vm319_vm2, %v1567_v34 }
 0x2b9   :  { %1412 = vmatprep.mubr.msk.f32.mxu0 %vm1934_vm0, %v1935_v2  ;;  %1527 = vmatpush3.bf16.msra.mxu0 %v1526_v51 }
 0x2ba   :  { %1410 = vmatprep.subr.mxu0 %v1935_v2 }
 0x2bd   :  { %1411 = vmatpush3.msra.mxu0 %v230_v52 }
 0x2be   :  { %1528 = vmatprep.subr.bf16.mxu0 %v1933_v1 }
 0x38b   :  { %v469_v45 = vpop.f32.mrb[4].mxu0 }
 0x38c   :  { %v470_v46 = vadd.f32 %v1263_v44, %v469_v45  ;;  %v1390_v47 = vpop.f32.mrb[5].mxu0 }
 0x38e   :  { %1568 = vtanh.f32 %v470_v46 }
 0x398   :  { %v1569_v48 = vpop.eup %1568 }
 0x399   :  { %1404 = vmatmul.mubr.msk.f32.vlgmr.msra.gmra.mrb[0].mxu1 %vm319_vm2, %v1569_v48 }
 0x39a   :  { %1424 = vmatprep.mubr.msk.f32.mxu1 %vm1934_vm0, %v1935_v2  ;;  %1423 = vmatpush3.msra.mxu1 %v728_v54 }
 0x39b   :  { %1534 = vmatprep.subr.bf16.mxu1 %v1933_v1 }
 0x39d   :  { %1425 = vmatmul.mubr.msk.f32.vlgmr.msra.gmra.mrb[2].mxu1 %vm729_vm3, %v715_v53 }
 0x39e   :  { %1427 = vmatprep.mubr.msk.f32.mxu1 %vm1934_vm0, %v1935_v2  ;;  %1536 = vmatpush3.bf16.msra.mxu1 %v1535_v33 }
 0x3a1   :  { %1428 = vmatmul.mubr.msk.f32.gmra.mrb[4].mxu1 %vm729_vm3, %v718_v59 }
 0x3a2   :  { %1430 = vmatprep.mubr.msk.f32.mxu1 %vm1934_vm0, %v1935_v2 }
 0x3a5   :  { %1431 = vmatmul.mubr.msk.f32.gmra.mrb[6].mxu1 %vm729_vm3, %v720_v60 }
 0x3a6   :  { %1433 = vmatprep.mubr.msk.f32.mxu1 %vm1934_vm0, %v1935_v2 }
 0x46c   :  { %v549_v56 = vpop.f32.mrb[0].mxu1 }
 0x46d   :  { %v550_v57 = vadd.f32 %v1265_v55, %v549_v56  ;;  %v1405_v58 = vpop.f32.mrb[1].mxu1 }
 0x46f   :  { %1570 = vtanh.f32 %v550_v57 }
 0x470   :  { %v810_v4 = vpop.f32.mrb[2].mxu1 }
 0x471   :  { %v1426_v8 = vpop.f32.mrb[3].mxu1 }
 0x479   :  { %v1571_v0 = vpop.eup %1570 }
 0x47a   :  { %1413 = vmatmul.mubr.msk.f32.vlgmr.msra.gmra.mrb[6].mxu0 %vm560_vm4, %v1571_v0 }
 0x47b   :  { %1530 = vmatpush3.bf16.msra.mxu0 %v1529_v63  ;;  %1419 = vmatprep.mubr.msk.f32.mxu0 %vm1934_vm0, %v1935_v2 }
 0x47c   :  { %1531 = vmatprep.subr.bf16.mxu0 %v1933_v1  ;;  %v815_v1 = vpop.f32.mrb[4].mxu1 }
 0x47d   :  { %v1429_v12 = vpop.f32.mrb[5].mxu1 }
 0x47e   :  { %1420 = vmatmul.mubr.msk.f32.vlgmr.msra.gmra.mrb[8].mxu0 %vm238_vm1, %v2203_v6  ;;  %v820_v14 = vpop.f32.mrb[6].mxu1  ;;  %v1294_v12 = vld [vmem:[%s2456_s19] ss:$0 sm:$0xff]  ;;  %s1940_s19 = smov 3  }
 0x47f   :  { %1449 = vmatprep.mubr.msk.f32.mxu0 %vm1934_vm0, %v1935_v2  ;;  %1533 = vmatpush3.bf16.msra.mxu0 %v1532_v9  ;;  %v1432_v15 = vpop.f32.mrb[7].mxu1  ;;  %v1286_v9 = vld [vmem:[%s2455_s18] ss:$0 sm:$0xff]  ;;  %s1939_s18 = smov 1  }
 0x54d   :  { %v630_v10 = vpop.f32.mrb[6].mxu0 }
 0x54e   :  { %v631_v11 = vadd.f32 %v1267_v3, %v630_v10  ;;  %v1414_v6 = vpop.f32.mrb[7].mxu0 }
 0x550   :  { %726 = vrot.lane.b32.xlu0 %v631_v11, %s1938_s2  ;;  %722 = vrot.lane.b32.xlu1 %v631_v11, %s1936_s7  ;;  %635 = vst.msk [vmem:[#allocation22] sm:$0xff] %vm634_vm5, %v631_v11 }
 0x551   :  { %1434 = vmatmul.mubr.msk.f32.gmra.mrb[8].mxu1 %vm729_vm3, %v631_v11  ;;  %v711_v16 = vpop.f32.mrb[8].mxu0 }
 0x552   :  { %1436 = vmatprep.mubr.msk.f32.mxu1 %vm1934_vm0, %v1935_v2  ;;  %v2328_v17 = vadd.f32 %v1269_v13, %v711_v16  ;;  %v1421_v18 = vpop.f32.mrb[9].mxu0 }
 0x554   :  { %724 = vrot.lane.b32.xlu1 %v631_v11, %s1937_s16  ;;  %v844_v19 = vadd.f32 %v810_v4, %v2328_v17  ;;  %v845_v20 = vadd.f32 %v815_v1, %v2328_v17  ;;  %v846_v21 = vadd.f32 %v820_v14, %v2328_v17 }
 0x556   :  { %1572 = vtanh.f32 %v844_v19 }
 0x557   :  { %1574 = vtanh.f32 %v845_v20 }
 0x558   :  { %1576 = vtanh.f32 %v846_v21 }
 0x560   :  { %v1573_v22 = vpop.eup %1572 }
 0x561   :  { %1450 = vmatmul.mubr.msk.f32.vlgmr.msra.gmra.mrb[10].mxu0 %vm238_vm1, %v1573_v22  ;;  %v1575_v23 = vpop.eup %1574 }
 0x562   :  { %1452 = vmatprep.mubr.msk.f32.mxu0 %vm1934_vm0, %v1935_v2  ;;  %v1577_v24 = vpop.eup %1576 }
 0x565   :  { %1453 = vmatmul.mubr.msk.f32.gmra.mrb[12].mxu0 %vm238_vm1, %v1575_v23 }
 0x566   :  { %1455 = vmatprep.mubr.msk.f32.mxu0 %vm1934_vm0, %v1935_v2 }
 0x569   :  { %1456 = vmatmul.mubr.msk.f32.gmra.mrb[14].mxu0 %vm238_vm1, %v1577_v24 }
 0x56a   :  { %1458 = vmatprep.mubr.msk.f32.mxu0 %vm1934_vm0, %v1935_v2 }
 0x5c2   :  { %v723_v25 = vpop.permute.xlu1 %722  ;;  %v727_v27 = vpop.permute.xlu0 %726 }
 0x5c3   :  { %1437 = vmatmul.mubr.msk.f32.gmra.mrb[10].mxu1 %vm729_vm3, %v723_v25 }
 0x5c4   :  { %1439 = vmatprep.mubr.msk.f32.mxu1 %vm1934_vm0, %v1935_v2 }
 0x5c6   :  { %v725_v26 = vpop.permute.xlu1 %724 }
 0x5c7   :  { %1440 = vmatmul.mubr.msk.f32.gmra.mrb[12].mxu1 %vm729_vm3, %v725_v26 }
 0x5c8   :  { %1442 = vmatprep.mubr.msk.f32.mxu1 %vm1934_vm0, %v1935_v2 }
 0x5cb   :  { %1443 = vmatmul.mubr.msk.f32.gmra.mrb[14].mxu1 %vm729_vm3, %v727_v27 }
 0x5cc   :  { %1474 = vmatprep.mubr.msk.f32.mxu1 %vm1934_vm0, %v1935_v2 }
 0x624   :  { %v825_v28 = vpop.f32.mrb[8].mxu1 }
 0x625   :  { %v847_v29 = vadd.f32 %v825_v28, %v2328_v17  ;;  %v1435_v30 = vpop.f32.mrb[9].mxu1 }
 0x627   :  { %1578 = vtanh.f32 %v847_v29 }
 0x631   :  { %v1579_v34 = vpop.eup %1578 }
 0x632   :  { %1459 = vmatmul.mubr.msk.f32.gmra.mrb[16].mxu0 %vm238_vm1, %v1579_v34 }
 0x633   :  { %1461 = vmatprep.mubr.msk.f32.mxu0 %vm1934_vm0, %v1935_v2 }
 0x634   :  { %v954_v36 = vpop.f32.mrb[10].mxu0 }
 0x635   :  { %v955_v37 = vadd.f32 %v2360_v35, %v954_v36  ;;  %v1451_v38 = vpop.f32.mrb[11].mxu0 }
 0x637   :  { %1580 = vtanh.f32 %v955_v37 }
 0x638   :  { %v959_v39 = vpop.f32.mrb[12].mxu0 }
 0x639   :  { %v960_v40 = vadd.f32 %v2360_v35, %v959_v39  ;;  %v1454_v41 = vpop.f32.mrb[13].mxu0 }
 0x63b   :  { %1582 = vtanh.f32 %v960_v40 }
 0x63c   :  { %v964_v42 = vpop.f32.mrb[14].mxu0 }
 0x63d   :  { %v965_v43 = vadd.f32 %v2360_v35, %v964_v42  ;;  %v1457_v44 = vpop.f32.mrb[15].mxu0 }
 0x63f   :  { %1584 = vtanh.f32 %v965_v43 }
 0x641   :  { %v1581_v45 = vpop.eup %1580 }
 0x642   :  { %1475 = vmatmul.mubr.msk.f32.vlgmr.msra.gmra.mrb[16].mxu1 %vm238_vm1, %v1581_v45 }
 0x643   :  { %1477 = vmatprep.mubr.msk.f32.mxu1 %vm1934_vm0, %v1935_v2 }
 0x645   :  { %v1583_v46 = vpop.eup %1582 }
 0x646   :  { %1478 = vmatmul.mubr.msk.f32.gmra.mrb[18].mxu1 %vm238_vm1, %v1583_v46 }
 0x647   :  { %1480 = vmatprep.mubr.msk.f32.mxu1 %vm1934_vm0, %v1935_v2 }
 0x649   :  { %v1585_v47 = vpop.eup %1584 }
 0x64a   :  { %1481 = vmatmul.mubr.msk.f32.gmra.mrb[20].mxu1 %vm238_vm1, %v1585_v47 }
 0x64b   :  { %1483 = vmatprep.mubr.msk.f32.mxu1 %vm1934_vm0, %v1935_v2 }
 0x696   :  { %v830_v48 = vpop.f32.mrb[10].mxu1 }
 0x697   :  { %v848_v49 = vadd.f32 %v830_v48, %v2328_v17  ;;  %v1438_v50 = vpop.f32.mrb[11].mxu1 }
 0x699   :  { %1586 = vtanh.f32 %v848_v49 }
 0x69a   :  { %v835_v51 = vpop.f32.mrb[12].mxu1 }
 0x69b   :  { %v849_v52 = vadd.f32 %v835_v51, %v2328_v17  ;;  %v1441_v53 = vpop.f32.mrb[13].mxu1 }
 0x69d   :  { %1588 = vtanh.f32 %v849_v52 }
 0x69e   :  { %v840_v54 = vpop.f32.mrb[14].mxu1 }
 0x69f   :  { %v850_v55 = vadd.f32 %v840_v54, %v2328_v17  ;;  %v1444_v56 = vpop.f32.mrb[15].mxu1 }
 0x6a0   :  { %v1295_v56 = vld [vmem:[#allocation2] ss:$0 sm:$0xff] }
 0x6a1   :  { %1590 = vtanh.f32 %v850_v55 }
 0x6a3   :  { %v1587_v57 = vpop.eup %1586 }
 0x6a4   :  { %1462 = vmatmul.mubr.msk.f32.gmra.mrb[18].mxu0 %vm238_vm1, %v1587_v57 }
 0x6a5   :  { %1464 = vmatprep.mubr.msk.f32.mxu0 %vm1934_vm0, %v1935_v2 }
 0x6a7   :  { %v1589_v58 = vpop.eup %1588 }
 0x6a8   :  { %1465 = vmatmul.mubr.msk.f32.gmra.mrb[20].mxu0 %vm238_vm1, %v1589_v58 }
 0x6a9   :  { %1467 = vmatprep.mubr.msk.f32.mxu0 %vm1934_vm0, %v1935_v2 }
 0x6ab   :  { %v1591_v59 = vpop.eup %1590 }
 0x6ac   :  { %1468 = vmatmul.mubr.msk.f32.gmra.mrb[22].mxu0 %vm238_vm1, %v1591_v59 }
 0x705   :  { %v969_v60 = vpop.f32.mrb[16].mxu0 }
 0x706   :  { %v970_v61 = vadd.f32 %v2360_v35, %v969_v60  ;;  %v1460_v62 = vpop.f32.mrb[17].mxu0 }
 0x708   :  { %1592 = vtanh.f32 %v970_v61 }
 0x712   :  { %v1593_v63 = vpop.eup %1592 }
 0x713   :  { %1484 = vmatmul.mubr.msk.f32.gmra.mrb[22].mxu1 %vm238_vm1, %v1593_v63 }
 0x714   :  { %1486 = vmatprep.mubr.msk.f32.mxu1 %vm1934_vm0, %v1935_v2 }
 0x715   :  { %v1091_v0 = vpop.f32.mrb[16].mxu1 }
 0x716   :  { %v1476_v3 = vpop.f32.mrb[17].mxu1  ;;  %v1092_v38 = vadd.f32 %v1286_v9, %v1091_v0 }
 0x719   :  { %v1096_v4 = vpop.f32.mrb[18].mxu1 }
 0x71a   :  { %v1479_v5 = vpop.f32.mrb[19].mxu1  ;;  %v1097_v10 = vadd.f32 %v1286_v9, %v1096_v4 }
 0x71c   :  { %1594 = vtanh.f32 %v1097_v10 }
 0x71d   :  { %v1101_v7 = vpop.f32.mrb[20].mxu1 }
 0x71e   :  { %v1482_v8 = vpop.f32.mrb[21].mxu1  ;;  %v1102_v1 = vadd.f32 %v1286_v9, %v1101_v7 }
 0x720   :  { %1596 = vtanh.f32 %v1102_v1 }
 0x726   :  { %v1595_v11 = vpop.eup %1594 }
 0x727   :  { %v1140_v13 = vmul.f32 %v1595_v11, %v1294_v12 }
 0x729   :  { %v1149_v15 = vsel %vm729_vm3, %v1140_v13, 0.0 }
 0x72a   :  { %v1597_v6 = vpop.eup %1596  ;;  %1150 = vadd.xlane.f32.xlu1 %v1149_v15 }
 0x72b   :  { %v1141_v14 = vmul.f32 %v1597_v6, %v1294_v12 }
 0x72d   :  { %v1152_v16 = vsel %vm729_vm3, %v1141_v14, 0.0 }
 0x72e   :  { %1153 = vadd.xlane.f32.xlu0 %v1152_v16 }
 0x777   :  { %v974_v17 = vpop.f32.mrb[18].mxu0 }
 0x778   :  { %v975_v18 = vadd.f32 %v2360_v35, %v974_v17  ;;  %v1463_v19 = vpop.f32.mrb[19].mxu0 }
 0x77a   :  { %1598 = vtanh.f32 %v975_v18 }
 0x77b   :  { %v979_v20 = vpop.f32.mrb[20].mxu0 }
 0x77c   :  { %v980_v21 = vadd.f32 %v2360_v35, %v979_v20  ;;  %v1466_v22 = vpop.f32.mrb[21].mxu0 }
 0x77e   :  { %1600 = vtanh.f32 %v980_v21 }
 0x77f   :  { %v984_v23 = vpop.f32.mrb[22].mxu0 }
 0x780   :  { %v985_v24 = vadd.f32 %v2360_v35, %v984_v23  ;;  %v1469_v25 = vpop.f32.mrb[23].mxu0 }
 0x782   :  { %1602 = vtanh.f32 %v985_v24 }
 0x784   :  { %v1599_v26 = vpop.eup %1598 }
 0x785   :  { %1487 = vmatmul.mubr.msk.f32.gmra.mrb[24].mxu1 %vm238_vm1, %v1599_v26 }
 0x786   :  { %1489 = vmatprep.mubr.msk.f32.mxu1 %vm1934_vm0, %v1935_v2 }
 0x788   :  { %v1601_v27 = vpop.eup %1600 }
 0x789   :  { %1490 = vmatmul.mubr.msk.f32.gmra.mrb[26].mxu1 %vm238_vm1, %v1601_v27 }
 0x78a   :  { %1492 = vmatprep.mubr.msk.f32.mxu1 %vm1934_vm0, %v1935_v2 }
 0x78c   :  { %v1603_v28 = vpop.eup %1602 }
 0x78d   :  { %1493 = vmatmul.mubr.msk.f32.gmra.mrb[28].mxu1 %vm238_vm1, %v1603_v28 }
 0x7b7   :  { %v1151_v57 = vpop.xlane.xlu1 %1150 }
 0x7b8   :  { %v1175_v58 = vadd.f32 %v1295_v56, %v1151_v57 }
 0x7bb   :  { %v1154_v59 = vpop.xlane.xlu0 %1153 }
 0x7bc   :  { %v1176_v60 = vadd.f32 %v1295_v56, %v1154_v59 }
 0x7e6   :  { %v1106_v29 = vpop.f32.mrb[22].mxu1 }
 0x7e7   :  { %v1107_v30 = vadd.f32 %v1286_v9, %v1106_v29  ;;  %v1485_v31 = vpop.f32.mrb[23].mxu1 }
 0x7e9   :  { %1604 = vtanh.f32 %v1107_v30 }
 0x7f3   :  { %v1605_v32 = vpop.eup %1604 }
 0x7f4   :  { %v1142_v33 = vmul.f32 %v1605_v32, %v1294_v12 }
 0x7f6   :  { %v1155_v34 = vsel %vm729_vm3, %v1142_v33, 0.0 }
 0x7f7   :  { %1156 = vadd.xlane.f32.xlu0 %v1155_v34 }
 0x858   :  { %v1111_v35 = vpop.f32.mrb[24].mxu1 }
 0x859   :  { %v1112_v36 = vadd.f32 %v1286_v9, %v1111_v35  ;;  %v1488_v37 = vpop.f32.mrb[25].mxu1 }
 0x85b   :  { %1606 = vtanh.f32 %v1112_v36 }
 0x85c   :  { %v1116_v39 = vpop.f32.mrb[26].mxu1  ;;  %1608 = vtanh.f32 %v1092_v38 }
 0x85d   :  { %v1117_v40 = vadd.f32 %v1286_v9, %v1116_v39  ;;  %v1491_v2 = vpop.f32.mrb[27].mxu1 }
 0x85f   :  { %1610 = vtanh.f32 %v1117_v40 }
 0x860   :  { %v1121_v41 = vpop.f32.mrb[28].mxu1 }
 0x861   :  { %v1122_v42 = vadd.f32 %v1286_v9, %v1121_v41  ;;  %v1494_v43 = vpop.f32.mrb[29].mxu1 }
 0x863   :  { %1612 = vtanh.f32 %v1122_v42 }
 0x865   :  { %v1607_v44 = vpop.eup %1606 }
 0x866   :  { %v1143_v45 = vmul.f32 %v1607_v44, %v1294_v12  ;;  %v1609_v46 = vpop.eup %1608 }
 0x867   :  { %v1139_v51 = vmul.f32 %v1609_v46, %v1294_v12 }
 0x868   :  { %v1158_v47 = vsel %vm729_vm3, %v1143_v45, 0.0 }
 0x869   :  { %v1611_v48 = vpop.eup %1610  ;;  %1159 = vadd.xlane.f32.xlu1 %v1158_v47  ;;  %v1146_v54 = vsel %vm729_vm3, %v1139_v51, 0.0 }
 0x86a   :  { %v1144_v49 = vmul.f32 %v1611_v48, %v1294_v12 }
 0x86c   :  { %v1161_v50 = vsel %vm729_vm3, %v1144_v49, 0.0 }
 0x86d   :  { %v1613_v52 = vpop.eup %1612  ;;  %1162 = vadd.xlane.f32.xlu0 %v1161_v50 }
 0x86e   :  { %v1145_v53 = vmul.f32 %v1613_v52, %v1294_v12 }
 0x870   :  { %v1164_v55 = vsel %vm729_vm3, %v1145_v53, 0.0 }
 0x871   :  { %1147 = vadd.xlane.f32.xlu0 %v1146_v54  ;;  %1165 = vadd.xlane.f32.xlu1 %v1164_v55 }
 0x882   :  { %1182 = vrot.lane.b32.xlu1 %v1175_v58, %s1939_s18 }
 0x884   :  { %v1157_v61 = vpop.xlane.xlu0 %1156 }
 0x885   :  { %v1177_v62 = vadd.f32 %v1295_v56, %v1157_v61 }
 0x887   :  { %1190 = vrot.lane.b32.xlu1 %v1177_v62, %s1940_s19  ;;  %1186 = vrot.lane.b32.xlu0 %v1176_v60, %s1941_s24 }
 0x8f6   :  { %v1160_v63 = vpop.xlane.xlu1 %1159 }
 0x8f7   :  { %v1178_v0 = vadd.f32 %v1295_v56, %v1160_v63 }
 0x8f9   :  { %1194 = vrot.lane.b32.xlu1 %v1178_v0, %s1942_s3 }
 0x8fa   :  { %v1163_v3 = vpop.xlane.xlu0 %1162 }
 0x8fb   :  { %v1179_v4 = vadd.f32 %v1295_v56, %v1163_v3 }
 0x8fd   :  { %1198 = vrot.lane.b32.xlu0 %v1179_v4, %s1943_s11 }
 0x8fe   :  { %v1166_v5 = vpop.xlane.xlu1 %1165 }
 0x8ff   :  { %v1180_v7 = vadd.f32 %v1295_v56, %v1166_v5 }
 0x901   :  { %1202 = vrot.lane.b32.xlu1 %v1180_v7, %s1944_s8 }
 0x902   :  { %1871 = shalt.err (!%p1868_p8)
}
 0x903   :  { %s1872_s16 = scalar_lea.hbm %s2459_s22, 128 }
 0x904   :  { %p1873_p9 = scmp.ne.s32.totalorder %s2459_s22, %s1872_s16  ;;  %p1876_p10 = scmp.lt.u32.totalorder %s1872_s16, %s2459_s22 }
 0x906   :  { %p1878_p11 = pnand %p1876_p10, %p1873_p9 }
 0x908   :  { %1881 = shalt.err (!%p1878_p11)
}
 0x909   :  { %1244 = dma.vmem_to_hbm [thread:$0]  %s1242_s25, 128, %s2459_s22, [#allocation23]   ;;  %v1183_v8 = vpop.permute.xlu1 %1182  ;;  %v1148_v9 = vpop.xlane.xlu0 %1147  ;;  %vm1205_vm6 = vcmask 7168   ;;  %vm1207_vm7 = vcmask 15360   ;;  %vm1209_vm8 = vcmask 23552   ;;  %vm1211_vm9 = vcmask 31744  }
 0x90a   :  { %v1174_v10 = vadd.f32 %v1295_v56, %v1148_v9  ;;  %vm1213_vm10 = vcmask 39936   ;;  %vm1215_vm11 = vcmask 48128   ;;  %s1946_s22 = smov [#allocation21]   ;;  %vm1223_vm12 = vcmask 56320  }
 0x90b   :  { %s1231_s30 = sshll.u32 %s1946_s22, 4  ;;  %s1232_s30 = int_to_ptr.vmem [resolvable:$true] %s1231_s30 }
 0x90c   :  { %v1206_v6 = vsel %vm1205_vm6, %v1174_v10, %v1183_v8  ;;  %s1882_s5 = scalar_lea.vmem %s1232_s30, 128  ;;  %p1887_p13 = scmp.lt.s32.totalorder %s1232_s30, %s1232_s30 }
 0x90d   :  { %v1191_v1 = vpop.permute.xlu1 %1190  ;;  %v1187_v11 = vpop.permute.xlu0 %1186  ;;  %p1883_p12 = scmp.ne.s32.totalorder %s1232_s30, %s1882_s5  ;;  %p1888_p0 = scmp.lt.s32.totalorder %s1882_s5, %s1882_s5 }
 0x90e   :  { %v1208_v13 = vsel %vm1207_vm7, %v1206_v6, %v1187_v11 }
 0x90f   :  { %v1210_v15 = vsel %vm1209_vm8, %v1208_v13, %v1191_v1  ;;  %p1889_p1 = por %p1888_p0, %p1887_p13 }
 0x911   :  { %p1890_p2 = pnand %p1889_p1, %p1883_p12 }
 0x96b   :  { %v1195_v12 = vpop.permute.xlu1 %1194 }
 0x96c   :  { %v1212_v16 = vsel %vm1211_vm9, %v1210_v15, %v1195_v12 }
 0x96f   :  { %v1199_v14 = vpop.permute.xlu0 %1198 }
 0x970   :  { %v1214_v17 = vsel %vm1213_vm10, %v1212_v16, %v1199_v14 }
 0x973   :  { %v1203_v18 = vpop.permute.xlu1 %1202 }
 0x974   :  { %v1216_v19 = vsel %vm1215_vm11, %v1214_v17, %v1203_v18 }
 0x975   :  { %v1296_v20 = vmul.f32 -1.442695, %v1216_v19 }
 0x977   :  { %1614 = vpow2.f32 %v1296_v20 }
 0x981   :  { %v1615_v21 = vpop.eup %1614 }
 0x982   :  { %v1220_v22 = vadd.f32 1.0, %v1615_v21 }
 0x984   :  { %1616 = vrcp.f32 %v1220_v22 }
 0x98e   :  { %v1617_v23 = vpop.eup %1616 }
 0x98f   :  { %1224 = vst.msk [vmem:[#allocation21] sm:$0xff] %vm1223_vm12, %v1617_v23 }
 0x990   :  { %1893 = shalt.err (!%p1890_p2)
}
 0x991   :  { %s1894_s9 = scalar_lea.hbm %s2458_s21, 128 }
 0x992   :  { %p1895_p3 = scmp.ne.s32.totalorder %s2458_s21, %s1894_s9  ;;  %p1898_p4 = scmp.lt.u32.totalorder %s1894_s9, %s2458_s21 }
 0x994   :  { %p1900_p5 = pnand %p1898_p4, %p1895_p3 }
 0x996   :  { %1903 = shalt.err (!%p1900_p5)
}
 0x997   :  { %1234 = dma.vmem_to_hbm [thread:$0]  %s1232_s30, 128, %s2458_s21, [#allocation5]  }
 0x998   :  { %1916 = dma.done.wait [#allocation5], 128  }
 0x999   :  { %1917 = vsyncadd [#allocation5], 4294967168 }
 0x99a   :  { %1918 = dma.done.wait [#allocation23], 128  }
 0x99b   :  { %1919 = vsyncadd [#allocation23], 4294967168 }
 0x99c   :  { %1251 = vsyncpa [#allocation4], 1 }
 0x99d   :  { %1252 = vsyncpa [#allocation7], 1 }
 0x99e   :  { %1253 = vsyncpa [#allocation10], 1 }
 0x99f   :  { %1254 = vsyncpa [#allocation13], 1 }
 0x9a0   :  { %1255 = vsyncpa [#allocation16], 1 }
 0x9a1   :  { %1256 = vsyncpa [#allocation19], 1 }
 0x9a2   :  { %1257 = vsyncpa [#allocation5], 1 }
 0x9a3   :  { %1258 = vsyncpa [#allocation23], 1 }

</bundles_post_ra>
